<compile_context>
chip_gen: v7x
topology: tpu7x:2x2x1
jax: 0.10.0
libtpu: 0.0.40
codegen_flags: <defaults>
</compile_context>

<pallas_src>
import functools

import jax
import jax.numpy as jnp
import numpy as np
from jax import lax
from jax.experimental import pallas as pl
from jax.experimental.pallas import tpu as pltpu


def st_conv_block_kernel(x_ref, a_ref, bc_ref, wt_ref, bt_ref,
                         gamma_ref, beta_ref, o_ref, *, Bblk, T, V, C, Kt):
    """Fused STConvBlock for one block of `Bblk` batch elements.

    x_ref    : (1, Bblk*T, V*C)   lane-dense input, columns (vertex, channel)
    a_ref    : (V*C, V*C)         fused Chebyshev graph-conv operator (bf16)
    bc_ref   : (1, V*C)           graph-conv bias, tiled per vertex
    wt_ref   : (Kt*C, 2C)         temporal causal-conv weights, [p | q] outputs
    bt_ref   : (1, 2C)            temporal conv bias, [p | q]
    gamma/beta : (1, C)           LayerNorm affine params
    o_ref    : (1, Bblk*T_out, V*C)  lane-dense output block
    """
    mm_dt = a_ref.dtype                       # matmul operand dtype (bf16)
    T_out = T - Kt + 1
    M = Bblk * T                              # (b, t) rows in the graph stage
    Rv = V * Bblk * T_out                     # (v, b, t_out) rows, temporal stage

    x = x_ref[0]                              # (M, V*C) float32, lane-dense

    # ---- Chebyshev graph conv: ONE fused matmul with the precomputed operator
    # A[(v,i),(h,j)] = sum_k T_k[h,v] * Wc[k,i,j];  K = N = V*C = 512 fills the
    # MXU (vs the previous K=16 propagation + K=96 weight matmuls).
    cheb = jnp.dot(x.astype(mm_dt), a_ref[...],
                   preferred_element_type=jnp.float32)         # (M, V*C) f32

    # GraphConvLayer bias + aligned-input residual, then the STConvBlock ReLU,
    # all on full 512-lane f32 rows.
    y = jnp.maximum(cheb + bc_ref[...] + x, 0.0)                # (M, V*C)

    # ---- Relayout to channel-minor rows ordered (v, b, t) for the per-vertex
    # temporal conv: V static lane slices + one aligned sublane concat.  Every
    # reshape below only regroups leading dims (minor dim stays C).
    y_cm = jnp.concatenate([y[:, v * C:(v + 1) * C] for v in range(V)], axis=0)
    y_cm = y_cm.reshape(V * Bblk, T, C)        # rows (v, b), time on sublanes

    # ---- Temporal causal conv (kernel (Kt, 1), no padding) + GLU: im2col over
    # the Kt taps, assembled in registers, and one fused matmul giving [p | q].
    cols = jnp.concatenate(
        [y_cm[:, kt:kt + T_out, :].reshape(Rv, C) for kt in range(Kt)], axis=-1)
    x_in = y_cm[:, Kt - 1:, :].reshape(Rv, C)                   # GLU residual (f32)
    pq = jnp.dot(cols.astype(mm_dt), wt_ref[...],
                 preferred_element_type=jnp.float32) + bt_ref[...]   # (Rv, 2C)
    z = (pq[:, :C] + x_in) * jax.nn.sigmoid(pq[:, C:])          # GLU, (Rv, C)

    # ---- LayerNorm over the channel dim (eps = 1e-12), affine, f32 ----
    mean = jnp.mean(z, axis=-1, keepdims=True)
    zc = z - mean
    var = jnp.mean(zc * zc, axis=-1, keepdims=True)
    zn = zc * lax.rsqrt(var + 1e-12) * gamma_ref[...] + beta_ref[...]

    # TODO(synk): dropout omitted (eval-mode identity); training-mode dropout
    #             would need pltpu.prng_* inside the kernel.

    # ---- Assemble the lane-dense (Bblk*T_out, V*C) output in registers
    # (leading-dim slices + lane concat) and store it with ONE unmasked store.
    zn_v = zn.reshape(V, Bblk * T_out, C)
    out = jnp.concatenate([zn_v[v] for v in range(V)], axis=-1)  # (Bblk*T_out, V*C)
    o_ref[0] = out


def _cheb_graph_operator(gso, wc, Ks, V, C):
    """Fused operator A[(v,i),(h,j)] = sum_k T_k[h,v] * Wc[k,i,j], (V*C, V*C) f32.

    T_0 = I, T_1 = gso, T_k = 2*gso @ T_{k-1} - T_{k-2} (Chebyshev recurrence).
    """
    g = gso.astype(jnp.float32)
    t_list = [jnp.eye(V, dtype=jnp.float32)]
    if Ks >= 2:
        t_list.append(g)
    for _ in range(2, Ks):
        t_list.append(2.0 * (g @ t_list[-1]) - t_list[-2])
    t = jnp.stack(t_list[:Ks], axis=0)                 # (Ks, V, V), T_k[h, v]
    w = wc.astype(jnp.float32)                         # (Ks, C, C)
    a = jnp.einsum('khv,kij->vihj', t, w)              # (V, C, V, C)
    return a.reshape(V * C, V * C)


_SINGLE_CORE_KINDS = ("v5e", "v5 lite", "v5lite", "v6e", "v6 lite", "v6lite")


def _num_parallel_blocks():
    """1 on single-TensorCore chips (v5e / v6e); 2 on megacore parts (v7x).

    Detection is a device-kind heuristic; a wrong answer only changes the
    batch-blocking (performance), never the math.  Unknown device kinds fall
    back to the merged single-block path, which is always correct.
    """
    try:
        kind = jax.devices()[0].device_kind.lower()
    except Exception:
        return 1
    return 1 if any(s in kind for s in _SINGLE_CORE_KINDS) else 2


def st_conv_block(x_nchw, params, *, Ks, Kt, matmul_dtype=jnp.bfloat16):
    """STConvBlock forward: NCHW (B, C_in, T, V) -> NCHW (B, C_out, T-Kt+1, V).

    Pass matmul_dtype=jnp.float32 for tighter parity with PyTorch (the bf16
    operator / activations keep errors well inside 5e-2 at these scales).
    """
    B, Cin, T, V = x_nchw.shape
    C = params["wc"].shape[2]
    T_out = T - Kt + 1

    # ---- Align module: c_in < c_out -> zero-pad channels ----
    if Cin < C:
        x_nchw = jnp.concatenate(
            [x_nchw, jnp.zeros((B, C - Cin, T, V), x_nchw.dtype)], axis=1)
    elif Cin > C:
        # TODO(synk): Align's 1x1-conv branch (c_in > c_out) not exercised here.
        raise NotImplementedError("c_in > c_out align-conv branch not implemented")

    # ---- Batch strategy: one merged block on single-TC chips; two fat
    # "parallel" blocks of ceil(B/2) on dual-core chips (v7x).  Odd B on the
    # dual-core path is zero-padded and sliced off after the kernel.
    G = 1 if B == 1 else _num_parallel_blocks()
    b_blk = -(-B // G)
    B_pad = G * b_blk
    x_f32 = x_nchw.astype(jnp.float32)
    if B_pad != B:
        x_f32 = jnp.concatenate(
            [x_f32, jnp.zeros((B_pad - B, C, T, V), jnp.float32)], axis=0)

    # Layout glue (plain XLA): NCHW -> lane-dense (G, Bblk*T, V*C).
    x_kern = jnp.transpose(x_f32, (0, 2, 3, 1)).reshape(G, b_blk * T, V * C)

    # Batch-independent parameter folding (wrapper-side, once).
    a_op = _cheb_graph_operator(params["gso"], params["wc"], Ks, V, C)
    a_op = a_op.astype(matmul_dtype)                              # (V*C, V*C)
    bc_t = jnp.tile(params["bc"].reshape(1, C).astype(jnp.float32), (1, V))
    wt_cat = jnp.concatenate([params["wtp"], params["wtq"]],
                             axis=-1).astype(jnp.float32)
    wt_cat = wt_cat.reshape(Kt * C, 2 * C).astype(matmul_dtype)
    bt = jnp.concatenate([params["btp"].reshape(1, C),
                          params["btq"].reshape(1, C)], axis=-1).astype(jnp.float32)
    gamma = params["gamma"].reshape(1, C).astype(jnp.float32)
    beta = params["beta"].reshape(1, C).astype(jnp.float32)

    kernel = functools.partial(st_conv_block_kernel,
                               Bblk=b_blk, T=T, V=V, C=C, Kt=Kt)

    def full(shape):
        return pl.BlockSpec(shape, lambda g: (0,) * len(shape))

    # TODO(synk): if T/V/C grow (the (V*C)^2 operator and merged batch are the
    # first things to outgrow v7x's 64 MiB VMEM), tile T with a Kt-1 halo and
    # set pltpu.CompilerParams(vmem_limit_bytes=...); current footprint < 2 MiB.
    out = pl.pallas_call(
        kernel,
        out_shape=jax.ShapeDtypeStruct((G, b_blk * T_out, V * C), jnp.float32),
        grid=(G,),
        in_specs=[
            pl.BlockSpec((1, b_blk * T, V * C), lambda g: (g, 0, 0)),
            full(a_op.shape),
            full(bc_t.shape),
            full(wt_cat.shape),
            full(bt.shape),
            full(gamma.shape),
            full(beta.shape),
        ],
        out_specs=pl.BlockSpec((1, b_blk * T_out, V * C), lambda g: (g, 0, 0)),
        compiler_params=pltpu.CompilerParams(dimension_semantics=("parallel",)),
    )(x_kern, a_op, bc_t, wt_cat, bt, gamma, beta)

    # Undo the layout glue: (G, Bblk*T_out, V*C) -> NCHW (B, C_out, T_out, V).
    out = out.reshape(B_pad, T_out, V, C)[:B]
    return jnp.transpose(out, (0, 3, 1, 2))


def st_conv_block_reference_np(x_nchw, params, *, Ks, Kt):
    """Pure NumPy (float64) reference mirroring the PyTorch forward exactly."""
    x = np.asarray(x_nchw, np.float64)
    gso = np.asarray(params["gso"], np.float64)
    wc = np.asarray(params["wc"], np.float64)
    bc = np.asarray(params["bc"], np.float64).reshape(-1)
    wtp = np.asarray(params["wtp"], np.float64)
    wtq = np.asarray(params["wtq"], np.float64)
    btp = np.asarray(params["btp"], np.float64).reshape(-1)
    btq = np.asarray(params["btq"], np.float64).reshape(-1)
    gamma = np.asarray(params["gamma"], np.float64).reshape(-1)
    beta = np.asarray(params["beta"], np.float64).reshape(-1)

    B, Cin, T, V = x.shape
    C = wc.shape[2]
    if Cin < C:                                     # Align (zero-pad channels)
        x = np.concatenate([x, np.zeros((B, C - Cin, T, V))], axis=1)
    xp = np.transpose(x, (0, 2, 3, 1))              # (B, T, V, C)

    x_list = [xp]
    if Ks >= 2:
        x_list.append(np.einsum("hi,btic->bthc", gso, xp))
    for k in range(2, Ks):
        x_list.append(2.0 * np.einsum("hi,btic->bthc", gso, x_list[k - 1])
                      - x_list[k - 2])
    xs = np.stack(x_list, axis=2)                   # (B, T, Ks, V, C)
    cheb = np.einsum("btkhi,kij->bthj", xs, wc) + bc
    y = np.maximum(cheb + xp, 0.0)                  # graph residual + ReLU

    T_out = T - Kt + 1
    x_in = y[:, Kt - 1:]
    p = np.zeros((B, T_out, V, C)) + btp
    q = np.zeros((B, T_out, V, C)) + btq
    for kt in range(Kt):
        seg = y[:, kt:kt + T_out]
        p = p + np.einsum("btvc,cd->btvd", seg, wtp[kt])
        q = q + np.einsum("btvc,cd->btvd", seg, wtq[kt])
    z = (p + x_in) / (1.0 + np.exp(-q))             # GLU

    mean = z.mean(axis=-1, keepdims=True)
    var = ((z - mean) ** 2).mean(axis=-1, keepdims=True)
    zn = (z - mean) / np.sqrt(var + 1e-12) * gamma + beta
    return np.transpose(zn, (0, 3, 1, 2))           # NCHW (B, C, T_out, V)


if __name__ == "__main__":
    # Small shapes: batch=2, in_channels=4, timestep=8, n_vertex=16,
    # out_channels=32, Ks=3 (Chebyshev order), Kt=3 (temporal kernel).
    B, Cin, T, V = 2, 4, 8, 16
    Cout, Ks, Kt = 32, 3, 3

    key = jax.random.PRNGKey(0)
    ks = jax.random.split(key, 8)
    x = jax.random.normal(ks[0], (B, Cin, T, V), jnp.float32)
    params = dict(
        gso=jax.random.normal(ks[1], (V, V), jnp.float32) / jnp.sqrt(V),
        wc=jax.random.normal(ks[2], (Ks, Cout, Cout), jnp.float32)
            / jnp.sqrt(Ks * Cout),
        bc=jax.random.normal(ks[3], (1, Cout), jnp.float32) * 0.01,
        wtp=jax.random.normal(ks[4], (Kt, Cout, Cout), jnp.float32)
            / jnp.sqrt(Kt * Cout),
        wtq=jax.random.normal(ks[5], (Kt, Cout, Cout), jnp.float32)
            / jnp.sqrt(Kt * Cout),
        btp=jax.random.normal(ks[6], (1, Cout), jnp.float32) * 0.01,
        btq=jax.random.normal(ks[7], (1, Cout), jnp.float32) * 0.01,
        gamma=jnp.ones((1, Cout), jnp.float32),   # nn.LayerNorm default affine
        beta=jnp.zeros((1, Cout), jnp.float32),
    )

    out = st_conv_block(x, params, Ks=Ks, Kt=Kt)
    out = jax.block_until_ready(out)
    assert out.shape == (B, Cout, T - Kt + 1, V), out.shape

    ref = st_conv_block_reference_np(
        np.asarray(x), {k: np.asarray(v) for k, v in params.items()}, Ks=Ks, Kt=Kt)
    # Tolerance covers bf16 MXU operands (f32 accumulation) vs a float64 reference.
    np.testing.assert_allclose(np.asarray(out, np.float64), ref,
                               rtol=5e-2, atol=5e-2)
    print("KERNEL_OK")
</pallas_src>

<mosaic_0001>
module attributes {stable_mosaic.version = 11 : i64} {
  func.func @st_conv_block_kernel(%arg0: i32, %arg1: memref<1x8x512xf32, #tpu.memory_space<vmem>>, %arg2: memref<512x512xbf16, #tpu.memory_space<vmem>>, %arg3: memref<1x512xf32, #tpu.memory_space<vmem>>, %arg4: memref<96x64xbf16, #tpu.memory_space<vmem>>, %arg5: memref<1x64xf32, #tpu.memory_space<vmem>>, %arg6: memref<1x32xf32, #tpu.memory_space<vmem>>, %arg7: memref<1x32xf32, #tpu.memory_space<vmem>>, %arg8: memref<1x6x512xf32, #tpu.memory_space<vmem>>) attributes {dimension_semantics = [#tpu.dimension_semantics<parallel>], iteration_bounds = array<i64: 2>, scalar_prefetch = 0 : i64, scratch_operands = 0 : i64, tpu.core_type = #tpu.core_type<tc>, window_params = [{transform_indices = @transform_0, window_bounds = array<i64: 1, 8, 512>}, {pipeline_mode = #tpu.pipeline_mode<synchronous>, transform_indices = @transform_1, window_bounds = array<i64: 512, 512>}, {pipeline_mode = #tpu.pipeline_mode<synchronous>, transform_indices = @transform_2, window_bounds = array<i64: 1, 512>}, {pipeline_mode = #tpu.pipeline_mode<synchronous>, transform_indices = @transform_3, window_bounds = array<i64: 96, 64>}, {pipeline_mode = #tpu.pipeline_mode<synchronous>, transform_indices = @transform_4, window_bounds = array<i64: 1, 64>}, {pipeline_mode = #tpu.pipeline_mode<synchronous>, transform_indices = @transform_5, window_bounds = array<i64: 1, 32>}, {pipeline_mode = #tpu.pipeline_mode<synchronous>, transform_indices = @transform_6, window_bounds = array<i64: 1, 32>}, {transform_indices = @transform_7, window_bounds = array<i64: 1, 6, 512>}]} {
    %c0 = arith.constant 0 : index
    %c0_0 = arith.constant 0 : index
    %c0_1 = arith.constant 0 : index
    %0 = vector.load %arg1[%c0, %c0_0, %c0_1] : memref<1x8x512xf32, #tpu.memory_space<vmem>>, vector<1x8x512xf32>
    %1 = vector.shape_cast %0 : vector<1x8x512xf32> to vector<8x512xf32>
    %2 = arith.truncf %1 : vector<8x512xf32> to vector<8x512xbf16>
    %c0_2 = arith.constant 0 : index
    %c0_3 = arith.constant 0 : index
    %3 = vector.load %arg2[%c0_2, %c0_3] : memref<512x512xbf16, #tpu.memory_space<vmem>>, vector<512x512xbf16>
    %cst = arith.constant dense<0.000000e+00> : vector<8x512xf32>
    %4 = tpu.matmul %2, %3, %cst {dimension_numbers = #tpu.dot_dimension_numbers<[1], [0], [0], [1], [0, 0, 1, 1], [], []>} : vector<8x512xbf16>, vector<512x512xbf16>, vector<8x512xf32> -> vector<8x512xf32>
    %c0_4 = arith.constant 0 : index
    %c0_5 = arith.constant 0 : index
    %5 = vector.load %arg3[%c0_4, %c0_5] : memref<1x512xf32, #tpu.memory_space<vmem>>, vector<1x512xf32>
    %6 = vector.broadcast %5 : vector<1x512xf32> to vector<8x512xf32>
    %7 = arith.addf %4, %6 : vector<8x512xf32>
    %8 = arith.addf %7, %1 : vector<8x512xf32>
    %cst_6 = arith.constant 0.000000e+00 : f32
    %9 = vector.broadcast %cst_6 : f32 to vector<8x512xf32>
    %10 = arith.maximumf %8, %9 : vector<8x512xf32>
    %11 = vector.extract_strided_slice %10 {offsets = [0, 0], sizes = [8, 32], strides = [1, 1]} : vector<8x512xf32> to vector<8x32xf32>
    %12 = vector.extract_strided_slice %10 {offsets = [0, 32], sizes = [8, 32], strides = [1, 1]} : vector<8x512xf32> to vector<8x32xf32>
    %13 = vector.extract_strided_slice %10 {offsets = [0, 64], sizes = [8, 32], strides = [1, 1]} : vector<8x512xf32> to vector<8x32xf32>
    %14 = vector.extract_strided_slice %10 {offsets = [0, 96], sizes = [8, 32], strides = [1, 1]} : vector<8x512xf32> to vector<8x32xf32>
    %15 = vector.extract_strided_slice %10 {offsets = [0, 128], sizes = [8, 32], strides = [1, 1]} : vector<8x512xf32> to vector<8x32xf32>
    %16 = vector.extract_strided_slice %10 {offsets = [0, 160], sizes = [8, 32], strides = [1, 1]} : vector<8x512xf32> to vector<8x32xf32>
    %17 = vector.extract_strided_slice %10 {offsets = [0, 192], sizes = [8, 32], strides = [1, 1]} : vector<8x512xf32> to vector<8x32xf32>
    %18 = vector.extract_strided_slice %10 {offsets = [0, 224], sizes = [8, 32], strides = [1, 1]} : vector<8x512xf32> to vector<8x32xf32>
    %19 = vector.extract_strided_slice %10 {offsets = [0, 256], sizes = [8, 32], strides = [1, 1]} : vector<8x512xf32> to vector<8x32xf32>
    %20 = vector.extract_strided_slice %10 {offsets = [0, 288], sizes = [8, 32], strides = [1, 1]} : vector<8x512xf32> to vector<8x32xf32>
    %21 = vector.extract_strided_slice %10 {offsets = [0, 320], sizes = [8, 32], strides = [1, 1]} : vector<8x512xf32> to vector<8x32xf32>
    %22 = vector.extract_strided_slice %10 {offsets = [0, 352], sizes = [8, 32], strides = [1, 1]} : vector<8x512xf32> to vector<8x32xf32>
    %23 = vector.extract_strided_slice %10 {offsets = [0, 384], sizes = [8, 32], strides = [1, 1]} : vector<8x512xf32> to vector<8x32xf32>
    %24 = vector.extract_strided_slice %10 {offsets = [0, 416], sizes = [8, 32], strides = [1, 1]} : vector<8x512xf32> to vector<8x32xf32>
    %25 = vector.extract_strided_slice %10 {offsets = [0, 448], sizes = [8, 32], strides = [1, 1]} : vector<8x512xf32> to vector<8x32xf32>
    %26 = vector.extract_strided_slice %10 {offsets = [0, 480], sizes = [8, 32], strides = [1, 1]} : vector<8x512xf32> to vector<8x32xf32>
    %27 = tpu.concatenate %11, %12, %13, %14, %15, %16, %17, %18, %19, %20, %21, %22, %23, %24, %25, %26 in 0 : vector<8x32xf32>, vector<8x32xf32>, vector<8x32xf32>, vector<8x32xf32>, vector<8x32xf32>, vector<8x32xf32>, vector<8x32xf32>, vector<8x32xf32>, vector<8x32xf32>, vector<8x32xf32>, vector<8x32xf32>, vector<8x32xf32>, vector<8x32xf32>, vector<8x32xf32>, vector<8x32xf32>, vector<8x32xf32> -> vector<128x32xf32>
    %28 = vector.shape_cast %27 : vector<128x32xf32> to vector<16x8x32xf32>
    %29 = vector.extract_strided_slice %28 {offsets = [0, 0, 0], sizes = [16, 6, 32], strides = [1, 1, 1]} : vector<16x8x32xf32> to vector<16x6x32xf32>
    %30 = vector.shape_cast %29 : vector<16x6x32xf32> to vector<96x32xf32>
    %31 = vector.extract_strided_slice %28 {offsets = [0, 1, 0], sizes = [16, 6, 32], strides = [1, 1, 1]} : vector<16x8x32xf32> to vector<16x6x32xf32>
    %32 = vector.shape_cast %31 : vector<16x6x32xf32> to vector<96x32xf32>
    %33 = vector.extract_strided_slice %28 {offsets = [0, 2, 0], sizes = [16, 6, 32], strides = [1, 1, 1]} : vector<16x8x32xf32> to vector<16x6x32xf32>
    %34 = vector.shape_cast %33 : vector<16x6x32xf32> to vector<96x32xf32>
    %35 = tpu.concatenate %30, %32, %34 in 1 : vector<96x32xf32>, vector<96x32xf32>, vector<96x32xf32> -> vector<96x96xf32>
    %36 = vector.extract_strided_slice %28 {offsets = [0, 2, 0], sizes = [16, 6, 32], strides = [1, 1, 1]} : vector<16x8x32xf32> to vector<16x6x32xf32>
    %37 = vector.shape_cast %36 : vector<16x6x32xf32> to vector<96x32xf32>
    %38 = arith.truncf %35 : vector<96x96xf32> to vector<96x96xbf16>
    %c0_7 = arith.constant 0 : index
    %c0_8 = arith.constant 0 : index
    %39 = vector.load %arg4[%c0_7, %c0_8] : memref<96x64xbf16, #tpu.memory_space<vmem>>, vector<96x64xbf16>
    %cst_9 = arith.constant dense<0.000000e+00> : vector<96x64xf32>
    %40 = tpu.matmul %38, %39, %cst_9 {dimension_numbers = #tpu.dot_dimension_numbers<[1], [0], [0], [1], [0, 0, 1, 1], [], []>} : vector<96x96xbf16>, vector<96x64xbf16>, vector<96x64xf32> -> vector<96x64xf32>
    %c0_10 = arith.constant 0 : index
    %c0_11 = arith.constant 0 : index
    %41 = vector.load %arg5[%c0_10, %c0_11] : memref<1x64xf32, #tpu.memory_space<vmem>>, vector<1x64xf32>
    %42 = vector.broadcast %41 : vector<1x64xf32> to vector<96x64xf32>
    %43 = arith.addf %40, %42 : vector<96x64xf32>
    %44 = vector.extract_strided_slice %43 {offsets = [0, 0], sizes = [96, 32], strides = [1, 1]} : vector<96x64xf32> to vector<96x32xf32>
    %45 = arith.addf %44, %37 : vector<96x32xf32>
    %46 = vector.extract_strided_slice %43 {offsets = [0, 32], sizes = [96, 32], strides = [1, 1]} : vector<96x64xf32> to vector<96x32xf32>
    %47 = arith.negf %46 : vector<96x32xf32>
    %48 = math.exp %47 : vector<96x32xf32>
    %cst_12 = arith.constant 1.000000e+00 : f32
    %49 = vector.broadcast %cst_12 : f32 to vector<96x32xf32>
    %50 = arith.addf %49, %48 : vector<96x32xf32>
    %51 = arith.divf %49, %50 : vector<96x32xf32>
    %52 = arith.mulf %45, %51 : vector<96x32xf32>
    %cst_13 = arith.constant dense<0.000000e+00> : vector<96xf32>
    %53 = vector.multi_reduction <add>, %52, %cst_13 [1] : vector<96x32xf32> to vector<96xf32>
    %54 = vector.shape_cast %53 : vector<96xf32> to vector<96x1xf32>
    %cst_14 = arith.constant 3.200000e+01 : f32
    %55 = vector.broadcast %cst_14 : f32 to vector<96x1xf32>
    %56 = arith.divf %54, %55 : vector<96x1xf32>
    %57 = vector.broadcast %56 : vector<96x1xf32> to vector<96x32xf32>
    %58 = arith.subf %52, %57 : vector<96x32xf32>
    %59 = arith.mulf %58, %58 : vector<96x32xf32>
    %cst_15 = arith.constant dense<0.000000e+00> : vector<96xf32>
    %60 = vector.multi_reduction <add>, %59, %cst_15 [1] : vector<96x32xf32> to vector<96xf32>
    %61 = vector.shape_cast %60 : vector<96xf32> to vector<96x1xf32>
    %cst_16 = arith.constant 3.200000e+01 : f32
    %62 = vector.broadcast %cst_16 : f32 to vector<96x1xf32>
    %63 = arith.divf %61, %62 : vector<96x1xf32>
    %cst_17 = arith.constant 9.99999996E-13 : f32
    %64 = vector.broadcast %cst_17 : f32 to vector<96x1xf32>
    %65 = arith.addf %63, %64 : vector<96x1xf32>
    %66 = math.rsqrt %65 : vector<96x1xf32>
    %67 = vector.broadcast %66 : vector<96x1xf32> to vector<96x32xf32>
    %68 = arith.mulf %58, %67 : vector<96x32xf32>
    %c0_18 = arith.constant 0 : index
    %c0_19 = arith.constant 0 : index
    %69 = vector.load %arg6[%c0_18, %c0_19] : memref<1x32xf32, #tpu.memory_space<vmem>>, vector<1x32xf32>
    %70 = vector.broadcast %69 : vector<1x32xf32> to vector<96x32xf32>
    %71 = arith.mulf %68, %70 : vector<96x32xf32>
    %c0_20 = arith.constant 0 : index
    %c0_21 = arith.constant 0 : index
    %72 = vector.load %arg7[%c0_20, %c0_21] : memref<1x32xf32, #tpu.memory_space<vmem>>, vector<1x32xf32>
    %73 = vector.broadcast %72 : vector<1x32xf32> to vector<96x32xf32>
    %74 = arith.addf %71, %73 : vector<96x32xf32>
    %75 = vector.shape_cast %74 : vector<96x32xf32> to vector<16x6x32xf32>
    %76 = vector.extract_strided_slice %75 {offsets = [0, 0, 0], sizes = [1, 6, 32], strides = [1, 1, 1]} : vector<16x6x32xf32> to vector<1x6x32xf32>
    %77 = vector.shape_cast %76 : vector<1x6x32xf32> to vector<6x32xf32>
    %78 = vector.extract_strided_slice %75 {offsets = [1, 0, 0], sizes = [1, 6, 32], strides = [1, 1, 1]} : vector<16x6x32xf32> to vector<1x6x32xf32>
    %79 = vector.shape_cast %78 : vector<1x6x32xf32> to vector<6x32xf32>
    %80 = vector.extract_strided_slice %75 {offsets = [2, 0, 0], sizes = [1, 6, 32], strides = [1, 1, 1]} : vector<16x6x32xf32> to vector<1x6x32xf32>
    %81 = vector.shape_cast %80 : vector<1x6x32xf32> to vector<6x32xf32>
    %82 = vector.extract_strided_slice %75 {offsets = [3, 0, 0], sizes = [1, 6, 32], strides = [1, 1, 1]} : vector<16x6x32xf32> to vector<1x6x32xf32>
    %83 = vector.shape_cast %82 : vector<1x6x32xf32> to vector<6x32xf32>
    %84 = vector.extract_strided_slice %75 {offsets = [4, 0, 0], sizes = [1, 6, 32], strides = [1, 1, 1]} : vector<16x6x32xf32> to vector<1x6x32xf32>
    %85 = vector.shape_cast %84 : vector<1x6x32xf32> to vector<6x32xf32>
    %86 = vector.extract_strided_slice %75 {offsets = [5, 0, 0], sizes = [1, 6, 32], strides = [1, 1, 1]} : vector<16x6x32xf32> to vector<1x6x32xf32>
    %87 = vector.shape_cast %86 : vector<1x6x32xf32> to vector<6x32xf32>
    %88 = vector.extract_strided_slice %75 {offsets = [6, 0, 0], sizes = [1, 6, 32], strides = [1, 1, 1]} : vector<16x6x32xf32> to vector<1x6x32xf32>
    %89 = vector.shape_cast %88 : vector<1x6x32xf32> to vector<6x32xf32>
    %90 = vector.extract_strided_slice %75 {offsets = [7, 0, 0], sizes = [1, 6, 32], strides = [1, 1, 1]} : vector<16x6x32xf32> to vector<1x6x32xf32>
    %91 = vector.shape_cast %90 : vector<1x6x32xf32> to vector<6x32xf32>
    %92 = vector.extract_strided_slice %75 {offsets = [8, 0, 0], sizes = [1, 6, 32], strides = [1, 1, 1]} : vector<16x6x32xf32> to vector<1x6x32xf32>
    %93 = vector.shape_cast %92 : vector<1x6x32xf32> to vector<6x32xf32>
    %94 = vector.extract_strided_slice %75 {offsets = [9, 0, 0], sizes = [1, 6, 32], strides = [1, 1, 1]} : vector<16x6x32xf32> to vector<1x6x32xf32>
    %95 = vector.shape_cast %94 : vector<1x6x32xf32> to vector<6x32xf32>
    %96 = vector.extract_strided_slice %75 {offsets = [10, 0, 0], sizes = [1, 6, 32], strides = [1, 1, 1]} : vector<16x6x32xf32> to vector<1x6x32xf32>
    %97 = vector.shape_cast %96 : vector<1x6x32xf32> to vector<6x32xf32>
    %98 = vector.extract_strided_slice %75 {offsets = [11, 0, 0], sizes = [1, 6, 32], strides = [1, 1, 1]} : vector<16x6x32xf32> to vector<1x6x32xf32>
    %99 = vector.shape_cast %98 : vector<1x6x32xf32> to vector<6x32xf32>
    %100 = vector.extract_strided_slice %75 {offsets = [12, 0, 0], sizes = [1, 6, 32], strides = [1, 1, 1]} : vector<16x6x32xf32> to vector<1x6x32xf32>
    %101 = vector.shape_cast %100 : vector<1x6x32xf32> to vector<6x32xf32>
    %102 = vector.extract_strided_slice %75 {offsets = [13, 0, 0], sizes = [1, 6, 32], strides = [1, 1, 1]} : vector<16x6x32xf32> to vector<1x6x32xf32>
    %103 = vector.shape_cast %102 : vector<1x6x32xf32> to vector<6x32xf32>
    %104 = vector.extract_strided_slice %75 {offsets = [14, 0, 0], sizes = [1, 6, 32], strides = [1, 1, 1]} : vector<16x6x32xf32> to vector<1x6x32xf32>
    %105 = vector.shape_cast %104 : vector<1x6x32xf32> to vector<6x32xf32>
    %106 = vector.extract_strided_slice %75 {offsets = [15, 0, 0], sizes = [1, 6, 32], strides = [1, 1, 1]} : vector<16x6x32xf32> to vector<1x6x32xf32>
    %107 = vector.shape_cast %106 : vector<1x6x32xf32> to vector<6x32xf32>
    %108 = tpu.concatenate %77, %79, %81, %83, %85, %87, %89, %91, %93, %95, %97, %99, %101, %103, %105, %107 in 1 : vector<6x32xf32>, vector<6x32xf32>, vector<6x32xf32>, vector<6x32xf32>, vector<6x32xf32>, vector<6x32xf32>, vector<6x32xf32>, vector<6x32xf32>, vector<6x32xf32>, vector<6x32xf32>, vector<6x32xf32>, vector<6x32xf32>, vector<6x32xf32>, vector<6x32xf32>, vector<6x32xf32>, vector<6x32xf32> -> vector<6x512xf32>
    %c0_22 = arith.constant 0 : index
    %c0_23 = arith.constant 0 : index
    %c0_24 = arith.constant 0 : index
    %109 = vector.load %arg8[%c0_22, %c0_23, %c0_24] : memref<1x6x512xf32, #tpu.memory_space<vmem>>, vector<1x6x512xf32>
    %110 = vector.shape_cast %109 : vector<1x6x512xf32> to vector<6x512xf32>
    %111 = vector.shape_cast %108 : vector<6x512xf32> to vector<1x6x512xf32>
    tpu.vector_store %arg8[%c0_22, %c0_23, %c0_24], %111 {strides = array<i32>} : memref<1x6x512xf32, #tpu.memory_space<vmem>>, vector<1x6x512xf32>,
    return
  }
  func.func @transform_0(%arg0: i32) -> (i32, i32, i32) {
    %c0_i32 = arith.constant 0 : i32
    %c0_i32_0 = arith.constant 0 : i32
    %c0_i32_1 = arith.constant 0 : i32
    return %arg0, %c0_i32, %c0_i32_0 : i32, i32, i32
  }
  func.func @transform_1(%arg0: i32) -> (i32, i32) {
    %c0_i32 = arith.constant 0 : i32
    %c0_i32_0 = arith.constant 0 : i32
    %c0_i32_1 = arith.constant 0 : i32
    return %c0_i32, %c0_i32_0 : i32, i32
  }
  func.func @transform_2(%arg0: i32) -> (i32, i32) {
    %c0_i32 = arith.constant 0 : i32
    %c0_i32_0 = arith.constant 0 : i32
    %c0_i32_1 = arith.constant 0 : i32
    return %c0_i32, %c0_i32_0 : i32, i32
  }
  func.func @transform_3(%arg0: i32) -> (i32, i32) {
    %c0_i32 = arith.constant 0 : i32
    %c0_i32_0 = arith.constant 0 : i32
    %c0_i32_1 = arith.constant 0 : i32
    return %c0_i32, %c0_i32_0 : i32, i32
  }
  func.func @transform_4(%arg0: i32) -> (i32, i32) {
    %c0_i32 = arith.constant 0 : i32
    %c0_i32_0 = arith.constant 0 : i32
    %c0_i32_1 = arith.constant 0 : i32
    return %c0_i32, %c0_i32_0 : i32, i32
  }
  func.func @transform_5(%arg0: i32) -> (i32, i32) {
    %c0_i32 = arith.constant 0 : i32
    %c0_i32_0 = arith.constant 0 : i32
    %c0_i32_1 = arith.constant 0 : i32
    return %c0_i32, %c0_i32_0 : i32, i32
  }
  func.func @transform_6(%arg0: i32) -> (i32, i32) {
    %c0_i32 = arith.constant 0 : i32
    %c0_i32_0 = arith.constant 0 : i32
    %c0_i32_1 = arith.constant 0 : i32
    return %c0_i32, %c0_i32_0 : i32, i32
  }
  func.func @transform_7(%arg0: i32) -> (i32, i32, i32) {
    %c0_i32 = arith.constant 0 : i32
    %c0_i32_0 = arith.constant 0 : i32
    %c0_i32_1 = arith.constant 0 : i32
    return %arg0, %c0_i32, %c0_i32_0 : i32, i32, i32
  }
}

</mosaic_0001>

<bundles_post_ra>
// kernel: tpu_custom_call.1
= control target key start
LH: loop header
LB: loop body
LE: loop exit
PB: predicated region body
PF: predicated region fallthrough
CT: control target
= control target key end

     0   :  { %12 = vsyncpa [#allocation3], 0  ;;  %s4245_s24 = smov 0   ;;  %s5632_s0 = inlined_call_operand.vmem [shape: f32[2,8,512], index: 0, kind: input, shape index: {}]   ;;  %s5633_s1 = inlined_call_operand.hbm [shape: bf16[512,512], index: 1, kind: input, shape index: {}]   ;;  %s5634_s2 = inlined_call_operand.vmem [shape: f32[1,512], index: 2, kind: input, shape index: {}]   ;;  %s5635_s3 = inlined_call_operand.vmem [shape: bf16[96,64], index: 3, kind: input, shape index: {}]   ;;  %s5636_s4 = inlined_call_operand.vmem [shape: f32[1,64], index: 4, kind: input, shape index: {}]   ;;  %s5637_s5 = inlined_call_operand.vmem [shape: f32[1,32], index: 5, kind: input, shape index: {}]   ;;  %s5638_s6 = inlined_call_operand.vmem [shape: f32[1,32], index: 6, kind: input, shape index: {}]   ;;  %s5639_s7 = inlined_call_operand.vmem [shape: f32[2,6,512], index: 7, kind: output, shape index: {}]  }
   0x1 LB: > { %s4251_s25 = sadd.s32 4294967295, %s4196_s24   ;;  %p3563_p0 = scmp.ge.s32.totalorder %s4196_s24, 1  ;;  %s4196_s24 = sphi %s4245_s24, %s18_s24  }
   0x2   : > { %p201_p1 = scmp.lt.s32.totalorder %s4196_s24, 3  ;;  %s4198_s26 = smov [#allocation2]  }
   0x3   : > { %s213_s27 = sshll.u32 %s4198_s26, 4  ;;  %p5640_p3 = scmp.eq.s32.totalorder %s4251_s25, 0  ;;  %s214_s27 = int_to_ptr.vmem [resolvable:$true] %s213_s27 }
   0x4   : > { %p4255_p2 = pnand %p3563_p0, %p201_p1  ;;  %s4158_s9 = scalar_lea.hbm %s5633_s1, 16384 }
   0x5   : > { %p4159_p6 = scmp.ne.s32.totalorder %s5633_s1, %s4158_s9  ;;  %p4165_p10 = scmp.lt.u32.totalorder %s4158_s9, %s5633_s1 }
   0x6   : > { %s5679_s28 = scalar_select %p4255_p2, 1, 0 }
   0x7   : > { %p3807_p4 = pneg %p4255_p2 }
   0x9   : > { %p4264_p5 = pnand %p5640_p3, %p3807_p4 }
   0xb   : > { %p4160_p7 = pneg %p4264_p5 }
   0xd   : > { %p4161_p8 = pnand %p4160_p7, %p4159_p6 }
   0xf   : > { %p4162_p9 = pneg %p4161_p8 }
  0x11   : > { %p4167_p11 = pnand %p4165_p10, %p4162_p9 }
  0x13   : > { %4170 = shalt.err (!%p4167_p11)
}
  0x14   : > { %s4171_s14 = scalar_lea.vmem %s214_s27, 16384  ;;  %p4179_p1 = scmp.lt.s32.totalorder %s214_s27, %s214_s27 }
  0x15   : > { %p4172_p12 = scmp.ne.s32.totalorder %s214_s27, %s4171_s14  ;;  %p4180_p4 = scmp.lt.s32.totalorder %s4171_s14, %s4171_s14 }
  0x17   : > { %p4174_p13 = pnand %p4172_p12, %p4160_p7  ;;  %p4181_p3 = por %p4180_p4, %p4179_p1 }
  0x19   : > { %p4175_p0 = pneg %p4174_p13 }
  0x1b   : > { %p4182_p2 = pnand %p4181_p3, %p4175_p0 }
  0x1d   : > { %4185 = shalt.err (!%p4182_p2)
}
  0x1e   : > { %s4199_s15 = smov 256   ;;  %s4200_s16 = smov 16  }
  0x1f   : > { %3810 = dma.hbm_to_vmem [thread:$0]  (!%p4264_p5), %s5633_s1, 16384, %s214_s27, [#allocation3], %s4199_s15, %s4199_s15, %s4200_s16  }
  0x20   : > { %p5681_p6 = scmp.ne.s32.totalorder %s5679_s28, 0 }
  0x22   : > { %252 = sbr.rel (%p5681_p6) target bundleno = 1517 (0x5ed), region = 48 }
  0x29   : > { %p5682_p8 = scmp.eq.s32.totalorder %s4251_s25, 0 }
  0x2b   : > { %4191 = dma.done.wait (%p5682_p8), [#allocation3], 16384   ;;  %p5683_p7 = pmov %p5682_p8 }
  0x2c   : > { %v3888_v0 = vld [vmem:[#allocation2 + $0x4] ss:$16 sps:$4 sm:$0xff]   ;;  %v3892_v2 = vld [vmem:[#allocation2] ss:$16 sps:$4 sm:$0xff]   ;;  %p284_p2 = scmp.lt.s32.totalorder %s4251_s25, 1  ;;  %s4202_s27 = smov 64  }
  0x2d   : > { %4193 = vsyncadd (%p5683_p7), [#allocation3], 4294950912  ;;  %v3890_v1 = vld [vmem:[#allocation2 + $0x204] ss:$16 sps:$4 sm:$0xff]   ;;  %1093 = vmatprep.subr.bf16.mxu0 %v3888_v0  ;;  %v3893_v3 = vld [vmem:[#allocation2 + $0x200] ss:$16 sps:$4 sm:$0xff]  }
  0x2e   : > { %1134 = vmatprep.subr.bf16.mxu1 %v3890_v1  ;;  %v3894_v4 = vld [vmem:[#allocation2 + $0x24] ss:$16 sps:$4 sm:$0xff]   ;;  %1094 = vmatpush1.bf16.msra.mxu0 %v3892_v2  ;;  %v3898_v6 = vld [vmem:[#allocation2 + $0x20] ss:$16 sps:$4 sm:$0xff]   ;;  %s5803_s25 = smov (!%p284_p2, %s4251_s25), 1  ;;  %s4203_s28 = smov 96  }
  0x2f   : > { %1135 = vmatpush1.bf16.msra.mxu1 %v3893_v3  ;;  %v3896_v5 = vld [vmem:[#allocation2 + $0x224] ss:$16 sps:$4 sm:$0xff]   ;;  %1095 = vmatprep.subr.bf16.mxu0 %v3894_v4  ;;  %v3899_v7 = vld [vmem:[#allocation2 + $0x220] ss:$16 sps:$4 sm:$0xff]   ;;  %s3753_s19 = sshll.u32 %s5803_s25, 5  ;;  %s4204_s29 = smov 32  }
  0x30   : > { %1136 = vmatprep.subr.bf16.mxu1 %v3896_v5  ;;  %v3900_v8 = vld [vmem:[#allocation2 + $0x44] ss:$16 sps:$4 sm:$0xff]   ;;  %v3904_v10 = vld [vmem:[#allocation2 + $0x40] ss:$16 sps:$4 sm:$0xff]   ;;  %s4300_s22 = scalar_lea.vmem %s5632_s0, %s3753_s19  ;;  %vm1565_vm0 = vcmask 1040384   ;;  %vm1566_vm1 = vcmask 1042434   ;;  %s293_s9 = scalar_lea.vmem %s5639_s7, %s3753_s19 }
  0x31   : > { %v3902_v9 = vld [vmem:[#allocation2 + $0x244] ss:$16 sps:$4 sm:$0xff]   ;;  %v3905_v11 = vld [vmem:[#allocation2 + $0x240] ss:$16 sps:$4 sm:$0xff]   ;;  %v4303_v46 = vld [vmem:[%s4300_s22 + $0x8] sm:$0xff]  ;;  %vm1568_vm3 = vcmask 1044484  }
  0x32   : > { %1096 = vmatpush1.bf16.msra.mxu0 %v3898_v6  ;;  %v3906_v12 = vld [vmem:[#allocation2 + $0x64] ss:$16 sps:$4 sm:$0xff]   ;;  %v3910_v14 = vld [vmem:[#allocation2 + $0x60] ss:$16 sps:$4 sm:$0xff]   ;;  %v4307_v49 = vpack.c.bf16 %v4303_v46, %v4303_v46  ;;  %v4310_v50 = vld [vmem:[%s4300_s22 + $0x18] sm:$0xff]  ;;  %vm1570_vm5 = vcmask 1046534  }
  0x33   : > { %1137 = vmatpush1.bf16.msra.mxu1 %v3899_v7  ;;  %1097 = vmatprep.subr.bf16.mxu0 %v3900_v8  ;;  %v3908_v13 = vld [vmem:[#allocation2 + $0x264] ss:$16 sps:$4 sm:$0xff]   ;;  %v3911_v15 = vld [vmem:[#allocation2 + $0x260] ss:$16 sps:$4 sm:$0xff]   ;;  %v302_v52 = vpack.c.bf16 %v4310_v50, %v4310_v50  ;;  %v3986_v6 = vld [vmem:[#allocation2 + $0xc] ss:$16 sps:$4 sm:$0xff]  }
  0x34   : > { %1138 = vmatprep.subr.bf16.mxu1 %v3902_v9  ;;  %v3912_v16 = vld [vmem:[#allocation2 + $0x84] ss:$16 sps:$4 sm:$0xff]   ;;  %v3916_v18 = vld [vmem:[#allocation2 + $0x80] ss:$16 sps:$4 sm:$0xff]   ;;  %1125 = vmatprep.mubr.bf16.mxu0 %v4307_v49  ;;  %v3989_v7 = vld [vmem:[#allocation2 + $0x20c] ss:$16 sps:$4 sm:$0xff]  }
  0x35   : > { %v3914_v17 = vld [vmem:[#allocation2 + $0x284] ss:$16 sps:$4 sm:$0xff]   ;;  %v3917_v19 = vld [vmem:[#allocation2 + $0x280] ss:$16 sps:$4 sm:$0xff]   ;;  %1166 = vmatprep.mubr.bf16.mxu1 %v302_v52  ;;  %vm1567_vm2 = vmor %vm1565_vm0, %vm1566_vm1  ;;  %vm2441_vm7 = vcmask 523264   ;;  %vm2428_vm8 = vcmask 261120  }
  0x36   : > { %1098 = vmatpush1.bf16.msra.mxu0 %v3904_v10  ;;  %v3918_v20 = vld [vmem:[#allocation2 + $0xa4] ss:$16 sps:$4 sm:$0xff]   ;;  %v3922_v22 = vld [vmem:[#allocation2 + $0xa0] ss:$16 sps:$4 sm:$0xff]   ;;  %v3984_v10 = vld [vmem:[#allocation2 + $0x8] ss:$16 sps:$4 sm:$0xff]  }
  0x37   : > { %1139 = vmatpush1.bf16.msra.mxu1 %v3905_v11  ;;  %1099 = vmatprep.subr.bf16.mxu0 %v3906_v12  ;;  %v3920_v21 = vld [vmem:[#allocation2 + $0x2a4] ss:$16 sps:$4 sm:$0xff]   ;;  %v3923_v23 = vld [vmem:[#allocation2 + $0x2a0] ss:$16 sps:$4 sm:$0xff]   ;;  %v3987_v11 = vld [vmem:[#allocation2 + $0x208] ss:$16 sps:$4 sm:$0xff]  }
  0x38   : > { %1140 = vmatprep.subr.bf16.mxu1 %v3908_v13  ;;  %v3924_v24 = vld [vmem:[#allocation2 + $0xc4] ss:$16 sps:$4 sm:$0xff]   ;;  %v3928_v26 = vld [vmem:[#allocation2 + $0xc0] ss:$16 sps:$4 sm:$0xff]   ;;  %v3992_v12 = vld [vmem:[#allocation2 + $0x2c] ss:$16 sps:$4 sm:$0xff]  }
  0x39   : > { %v3926_v25 = vld [vmem:[#allocation2 + $0x2c4] ss:$16 sps:$4 sm:$0xff]   ;;  %v3929_v27 = vld [vmem:[#allocation2 + $0x2c0] ss:$16 sps:$4 sm:$0xff]   ;;  %v3995_v13 = vld [vmem:[#allocation2 + $0x22c] ss:$16 sps:$4 sm:$0xff]  }
  0x3a   : > { %1100 = vmatpush1.bf16.msra.mxu0 %v3910_v14  ;;  %v3930_v28 = vld [vmem:[#allocation2 + $0xe4] ss:$16 sps:$4 sm:$0xff]   ;;  %v3934_v30 = vld [vmem:[#allocation2 + $0xe0] ss:$16 sps:$4 sm:$0xff]   ;;  %v3990_v14 = vld [vmem:[#allocation2 + $0x28] ss:$16 sps:$4 sm:$0xff]  }
  0x3b   : > { %1141 = vmatpush1.bf16.msra.mxu1 %v3911_v15  ;;  %1101 = vmatprep.subr.bf16.mxu0 %v3912_v16  ;;  %v3932_v29 = vld [vmem:[#allocation2 + $0x2e4] ss:$16 sps:$4 sm:$0xff]   ;;  %v3935_v31 = vld [vmem:[#allocation2 + $0x2e0] ss:$16 sps:$4 sm:$0xff]   ;;  %v3993_v15 = vld [vmem:[#allocation2 + $0x228] ss:$16 sps:$4 sm:$0xff]  }
  0x3c   : > { %1142 = vmatprep.subr.bf16.mxu1 %v3914_v17  ;;  %v3936_v32 = vld [vmem:[#allocation2 + $0x104] ss:$16 sps:$4 sm:$0xff]   ;;  %v3940_v34 = vld [vmem:[#allocation2 + $0x100] ss:$16 sps:$4 sm:$0xff]   ;;  %v3998_v16 = vld [vmem:[#allocation2 + $0x4c] ss:$16 sps:$4 sm:$0xff]  }
  0x3d   : > { %v3938_v33 = vld [vmem:[#allocation2 + $0x304] ss:$16 sps:$4 sm:$0xff]   ;;  %v3941_v35 = vld [vmem:[#allocation2 + $0x300] ss:$16 sps:$4 sm:$0xff]   ;;  %v4001_v17 = vld [vmem:[#allocation2 + $0x24c] ss:$16 sps:$4 sm:$0xff]  }
  0x3e   : > { %1102 = vmatpush1.bf16.msra.mxu0 %v3916_v18  ;;  %v3942_v36 = vld [vmem:[#allocation2 + $0x124] ss:$16 sps:$4 sm:$0xff]   ;;  %v3946_v38 = vld [vmem:[#allocation2 + $0x120] ss:$16 sps:$4 sm:$0xff]   ;;  %v3996_v18 = vld [vmem:[#allocation2 + $0x48] ss:$16 sps:$4 sm:$0xff]  }
  0x3f   : > { %1143 = vmatpush1.bf16.msra.mxu1 %v3917_v19  ;;  %1103 = vmatprep.subr.bf16.mxu0 %v3918_v20  ;;  %v3944_v37 = vld [vmem:[#allocation2 + $0x324] ss:$16 sps:$4 sm:$0xff]   ;;  %v3947_v39 = vld [vmem:[#allocation2 + $0x320] ss:$16 sps:$4 sm:$0xff]   ;;  %v3999_v19 = vld [vmem:[#allocation2 + $0x248] ss:$16 sps:$4 sm:$0xff]  }
  0x40   : > { %1144 = vmatprep.subr.bf16.mxu1 %v3920_v21  ;;  %v3948_v40 = vld [vmem:[#allocation2 + $0x144] ss:$16 sps:$4 sm:$0xff]   ;;  %v3952_v42 = vld [vmem:[#allocation2 + $0x140] ss:$16 sps:$4 sm:$0xff]   ;;  %v4004_v20 = vld [vmem:[#allocation2 + $0x6c] ss:$16 sps:$4 sm:$0xff]  }
  0x41   : > { %v3950_v41 = vld [vmem:[#allocation2 + $0x344] ss:$16 sps:$4 sm:$0xff]   ;;  %v3953_v43 = vld [vmem:[#allocation2 + $0x340] ss:$16 sps:$4 sm:$0xff]   ;;  %v4007_v21 = vld [vmem:[#allocation2 + $0x26c] ss:$16 sps:$4 sm:$0xff]  }
  0x42   : > { %1104 = vmatpush1.bf16.msra.mxu0 %v3922_v22  ;;  %v3954_v44 = vld [vmem:[#allocation2 + $0x164] ss:$16 sps:$4 sm:$0xff]   ;;  %v3958_v47 = vld [vmem:[#allocation2 + $0x160] ss:$16 sps:$4 sm:$0xff]   ;;  %v4002_v22 = vld [vmem:[#allocation2 + $0x68] ss:$16 sps:$4 sm:$0xff]  }
  0x43   : > { %1145 = vmatpush1.bf16.msra.mxu1 %v3923_v23  ;;  %1105 = vmatprep.subr.bf16.mxu0 %v3924_v24  ;;  %v3956_v45 = vld [vmem:[#allocation2 + $0x364] ss:$16 sps:$4 sm:$0xff]   ;;  %v3959_v48 = vld [vmem:[#allocation2 + $0x360] ss:$16 sps:$4 sm:$0xff]   ;;  %v4005_v23 = vld [vmem:[#allocation2 + $0x268] ss:$16 sps:$4 sm:$0xff]  }
  0x44   : > { %1146 = vmatprep.subr.bf16.mxu1 %v3926_v25  ;;  %v3960_v51 = vld [vmem:[#allocation2 + $0x184] ss:$16 sps:$4 sm:$0xff]   ;;  %v3964_v54 = vld [vmem:[#allocation2 + $0x180] ss:$16 sps:$4 sm:$0xff]   ;;  %v4010_v24 = vld [vmem:[#allocation2 + $0x8c] ss:$16 sps:$4 sm:$0xff]  }
  0x45   : > { %v3962_v53 = vld [vmem:[#allocation2 + $0x384] ss:$16 sps:$4 sm:$0xff]   ;;  %v3965_v55 = vld [vmem:[#allocation2 + $0x380] ss:$16 sps:$4 sm:$0xff]   ;;  %v4013_v25 = vld [vmem:[#allocation2 + $0x28c] ss:$16 sps:$4 sm:$0xff]  }
  0x46   : > { %1106 = vmatpush1.bf16.msra.mxu0 %v3928_v26  ;;  %v3966_v56 = vld [vmem:[#allocation2 + $0x1a4] ss:$16 sps:$4 sm:$0xff]   ;;  %v3970_v58 = vld [vmem:[#allocation2 + $0x1a0] ss:$16 sps:$4 sm:$0xff]   ;;  %v4008_v26 = vld [vmem:[#allocation2 + $0x88] ss:$16 sps:$4 sm:$0xff]  }
  0x47   : > { %1147 = vmatpush1.bf16.msra.mxu1 %v3929_v27  ;;  %1107 = vmatprep.subr.bf16.mxu0 %v3930_v28  ;;  %v3968_v57 = vld [vmem:[#allocation2 + $0x3a4] ss:$16 sps:$4 sm:$0xff]   ;;  %v3971_v59 = vld [vmem:[#allocation2 + $0x3a0] ss:$16 sps:$4 sm:$0xff]   ;;  %v4011_v27 = vld [vmem:[#allocation2 + $0x288] ss:$16 sps:$4 sm:$0xff]  }
  0x48   : > { %1148 = vmatprep.subr.bf16.mxu1 %v3932_v29  ;;  %v3972_v60 = vld [vmem:[#allocation2 + $0x1c4] ss:$16 sps:$4 sm:$0xff]   ;;  %v3976_v62 = vld [vmem:[#allocation2 + $0x1c0] ss:$16 sps:$4 sm:$0xff]   ;;  %v4016_v28 = vld [vmem:[#allocation2 + $0xac] ss:$16 sps:$4 sm:$0xff]  }
  0x49   : > { %v3974_v61 = vld [vmem:[#allocation2 + $0x3c4] ss:$16 sps:$4 sm:$0xff]   ;;  %v3977_v63 = vld [vmem:[#allocation2 + $0x3c0] ss:$16 sps:$4 sm:$0xff]   ;;  %v4019_v29 = vld [vmem:[#allocation2 + $0x2ac] ss:$16 sps:$4 sm:$0xff]  }
  0x4a   : > { %1108 = vmatpush1.bf16.msra.mxu0 %v3934_v30  ;;  %v3978_v0 = vld [vmem:[#allocation2 + $0x1e4] ss:$16 sps:$4 sm:$0xff]   ;;  %v3982_v2 = vld [vmem:[#allocation2 + $0x1e0] ss:$16 sps:$4 sm:$0xff]   ;;  %v4014_v30 = vld [vmem:[#allocation2 + $0xa8] ss:$16 sps:$4 sm:$0xff]  }
  0x4b   : > { %1149 = vmatpush1.bf16.msra.mxu1 %v3935_v31  ;;  %1109 = vmatprep.subr.bf16.mxu0 %v3936_v32  ;;  %v3980_v1 = vld [vmem:[#allocation2 + $0x3e4] ss:$16 sps:$4 sm:$0xff]   ;;  %v3983_v3 = vld [vmem:[#allocation2 + $0x3e0] ss:$16 sps:$4 sm:$0xff]   ;;  %v4017_v31 = vld [vmem:[#allocation2 + $0x2a8] ss:$16 sps:$4 sm:$0xff]  }
  0x4c   : > { %1150 = vmatprep.subr.bf16.mxu1 %v3938_v33  ;;  %v4316_v4 = vld [vmem:[%s4300_s22] sm:$0xff]  ;;  %v4319_v5 = vld [vmem:[%s4300_s22 + $0x10] sm:$0xff]  ;;  %v4022_v32 = vld [vmem:[#allocation2 + $0xcc] ss:$16 sps:$4 sm:$0xff]   ;;  %vm2515_vm9 = vcmask 785408  }
  0x4d   : > { %v4323_v8 = vpack.c.bf16 %v4316_v4, %v4316_v4  ;;  %v4327_v9 = vpack.c.bf16 %v4319_v5, %v4319_v5  ;;  %v4025_v33 = vld [vmem:[#allocation2 + $0x2cc] ss:$16 sps:$4 sm:$0xff]   ;;  %vm1569_vm4 = vmor %vm1567_vm2, %vm1568_vm3 }
  0x4e   : > { %1110 = vmatpush1.bf16.msra.mxu0 %v3940_v34  ;;  %v4020_v34 = vld [vmem:[#allocation2 + $0xc8] ss:$16 sps:$4 sm:$0xff]   ;;  %vm4418_vm6 = vmor %vm1569_vm4, %vm1570_vm5 }
  0x4f   : > { %1151 = vmatpush1.bf16.msra.mxu1 %v3941_v35  ;;  %1111 = vmatprep.subr.bf16.mxu0 %v3942_v36  ;;  %v4023_v35 = vld [vmem:[#allocation2 + $0x2c8] ss:$16 sps:$4 sm:$0xff]   ;;  %v4028_v36 = vld [vmem:[#allocation2 + $0xec] ss:$16 sps:$4 sm:$0xff]  }
  0x50   : > { %1152 = vmatprep.subr.bf16.mxu1 %v3944_v37  ;;  %v4031_v37 = vld [vmem:[#allocation2 + $0x2ec] ss:$16 sps:$4 sm:$0xff]  }
  0x52   : > { %1112 = vmatpush1.bf16.msra.mxu0 %v3946_v38  ;;  %v4026_v38 = vld [vmem:[#allocation2 + $0xe8] ss:$16 sps:$4 sm:$0xff]  }
  0x53   : > { %1153 = vmatpush1.bf16.msra.mxu1 %v3947_v39  ;;  %1113 = vmatprep.subr.bf16.mxu0 %v3948_v40  ;;  %v4029_v39 = vld [vmem:[#allocation2 + $0x2e8] ss:$16 sps:$4 sm:$0xff]   ;;  %v4034_v40 = vld [vmem:[#allocation2 + $0x10c] ss:$16 sps:$4 sm:$0xff]  }
  0x54   : > { %1154 = vmatprep.subr.bf16.mxu1 %v3950_v41  ;;  %v4037_v41 = vld [vmem:[#allocation2 + $0x30c] ss:$16 sps:$4 sm:$0xff]  }
  0x56   : > { %1114 = vmatpush1.bf16.msra.mxu0 %v3952_v42  ;;  %v4032_v42 = vld [vmem:[#allocation2 + $0x108] ss:$16 sps:$4 sm:$0xff]  }
  0x57   : > { %1155 = vmatpush1.bf16.msra.mxu1 %v3953_v43  ;;  %1115 = vmatprep.subr.bf16.mxu0 %v3954_v44  ;;  %v4035_v43 = vld [vmem:[#allocation2 + $0x308] ss:$16 sps:$4 sm:$0xff]   ;;  %v4040_v44 = vld [vmem:[#allocation2 + $0x12c] ss:$16 sps:$4 sm:$0xff]  }
  0x58   : > { %1156 = vmatprep.subr.bf16.mxu1 %v3956_v45  ;;  %v4043_v45 = vld [vmem:[#allocation2 + $0x32c] ss:$16 sps:$4 sm:$0xff]  }
  0x5a   : > { %1116 = vmatpush1.bf16.msra.mxu0 %v3958_v47  ;;  %v4038_v47 = vld [vmem:[#allocation2 + $0x128] ss:$16 sps:$4 sm:$0xff]  }
  0x5b   : > { %1157 = vmatpush1.bf16.msra.mxu1 %v3959_v48  ;;  %1117 = vmatprep.subr.bf16.mxu0 %v3960_v51  ;;  %v4041_v48 = vld [vmem:[#allocation2 + $0x328] ss:$16 sps:$4 sm:$0xff]   ;;  %v4049_v51 = vld [vmem:[#allocation2 + $0x34c] ss:$16 sps:$4 sm:$0xff]  }
  0x5c   : > { %1158 = vmatprep.subr.bf16.mxu1 %v3962_v53  ;;  %v4047_v53 = vld [vmem:[#allocation2 + $0x348] ss:$16 sps:$4 sm:$0xff]  }
  0x5e   : > { %1118 = vmatpush1.bf16.msra.mxu0 %v3964_v54  ;;  %v4052_v54 = vld [vmem:[#allocation2 + $0x16c] ss:$16 sps:$4 sm:$0xff]  }
  0x5f   : > { %1159 = vmatpush1.bf16.msra.mxu1 %v3965_v55  ;;  %1119 = vmatprep.subr.bf16.mxu0 %v3966_v56  ;;  %v4055_v55 = vld [vmem:[#allocation2 + $0x36c] ss:$16 sps:$4 sm:$0xff]   ;;  %v4050_v56 = vld [vmem:[#allocation2 + $0x168] ss:$16 sps:$4 sm:$0xff]  }
  0x60   : > { %1160 = vmatprep.subr.bf16.mxu1 %v3968_v57  ;;  %v4053_v57 = vld [vmem:[#allocation2 + $0x368] ss:$16 sps:$4 sm:$0xff]  }
  0x62   : > { %1120 = vmatpush1.bf16.msra.mxu0 %v3970_v58  ;;  %v4058_v58 = vld [vmem:[#allocation2 + $0x18c] ss:$16 sps:$4 sm:$0xff]  }
  0x63   : > { %1161 = vmatpush1.bf16.msra.mxu1 %v3971_v59  ;;  %1121 = vmatprep.subr.bf16.mxu0 %v3972_v60  ;;  %v4061_v59 = vld [vmem:[#allocation2 + $0x38c] ss:$16 sps:$4 sm:$0xff]   ;;  %v4056_v60 = vld [vmem:[#allocation2 + $0x188] ss:$16 sps:$4 sm:$0xff]  }
  0x64   : > { %1162 = vmatprep.subr.bf16.mxu1 %v3974_v61  ;;  %v4059_v61 = vld [vmem:[#allocation2 + $0x388] ss:$16 sps:$4 sm:$0xff]  }
  0x66   : > { %1122 = vmatpush1.bf16.msra.mxu0 %v3976_v62  ;;  %v4064_v62 = vld [vmem:[#allocation2 + $0x1ac] ss:$16 sps:$4 sm:$0xff]  }
  0x67   : > { %1163 = vmatpush1.bf16.msra.mxu1 %v3977_v63  ;;  %1123 = vmatprep.subr.bf16.mxu0 %v3978_v0  ;;  %v4067_v63 = vld [vmem:[#allocation2 + $0x3ac] ss:$16 sps:$4 sm:$0xff]   ;;  %v4062_v0 = vld [vmem:[#allocation2 + $0x1a8] ss:$16 sps:$4 sm:$0xff]  }
  0x68   : > { %1164 = vmatprep.subr.bf16.mxu1 %v3980_v1  ;;  %v4065_v1 = vld [vmem:[#allocation2 + $0x3a8] ss:$16 sps:$4 sm:$0xff]  }
  0x6a   : > { %1124 = vmatpush1.bf16.msra.mxu0 %v3982_v2  ;;  %v4070_v2 = vld [vmem:[#allocation2 + $0x1cc] ss:$16 sps:$4 sm:$0xff]  }
  0x6b   : > { %1165 = vmatpush1.bf16.msra.mxu1 %v3983_v3  ;;  %1175 = vmatprep.subr.bf16.mxu0 %v3986_v6  ;;  %v4073_v3 = vld [vmem:[#allocation2 + $0x3cc] ss:$16 sps:$4 sm:$0xff]   ;;  %v4068_v6 = vld [vmem:[#allocation2 + $0x1c8] ss:$16 sps:$4 sm:$0xff]  }
  0x6c   : > { %1216 = vmatprep.subr.bf16.mxu1 %v3989_v7  ;;  %v4071_v7 = vld [vmem:[#allocation2 + $0x3c8] ss:$16 sps:$4 sm:$0xff]  }
  0x6d   : > { %1126 = vmatmul.mubr.bf16.vlgmr.msra.gmra.mrb[0].mxu0 %v4323_v8 }
  0x6e   : > { %1167 = vmatmul.mubr.bf16.vlgmr.msra.gmra.mrb[0].mxu1 %v4327_v9  ;;  %1176 = vmatpush1.bf16.msra.mxu0 %v3984_v10  ;;  %v4076_v10 = vld [vmem:[#allocation2 + $0x1ec] ss:$16 sps:$4 sm:$0xff]  }
  0x6f   : > { %1217 = vmatpush1.bf16.msra.mxu1 %v3987_v11  ;;  %1177 = vmatprep.subr.bf16.mxu0 %v3992_v12  ;;  %v4079_v11 = vld [vmem:[#allocation2 + $0x3ec] ss:$16 sps:$4 sm:$0xff]   ;;  %v4074_v12 = vld [vmem:[#allocation2 + $0x1e8] ss:$16 sps:$4 sm:$0xff]  }
  0x70   : > { %1218 = vmatprep.subr.bf16.mxu1 %v3995_v13  ;;  %1207 = vmatprep.mubr.bf16.mxu0 %v4307_v49  ;;  %v4046_v49 = vld [vmem:[#allocation2 + $0x14c] ss:$16 sps:$4 sm:$0xff]   ;;  %v4077_v13 = vld [vmem:[#allocation2 + $0x3e8] ss:$16 sps:$4 sm:$0xff]  }
  0x71   : > { %1248 = vmatprep.mubr.bf16.mxu1 %v302_v52  ;;  %v4044_v52 = vld [vmem:[#allocation2 + $0x148] ss:$16 sps:$4 sm:$0xff]  }
  0x72   : > { %1178 = vmatpush1.bf16.msra.mxu0 %v3990_v14  ;;  %v433_v14 = vlaneseq }
  0x73   : > { %1219 = vmatpush1.bf16.msra.mxu1 %v3993_v15  ;;  %1179 = vmatprep.subr.bf16.mxu0 %v3998_v16 }
  0x74   : > { %1220 = vmatprep.subr.bf16.mxu1 %v4001_v17  ;;  %v434_v15 = vshrl.u32 %v433_v14, 7  ;;  %v431_v17 = vld [vmem:[%s5634_s2] sm:$0xf] }
  0x76   : > { %1180 = vmatpush1.bf16.msra.mxu0 %v3996_v18  ;;  %v435_v16 = vsub.s32 0, %v434_v15  ;;  %v439_v18 = vsub.s32 1, %v434_v15 }
  0x77   : > { %1221 = vmatpush1.bf16.msra.mxu1 %v3999_v19  ;;  %1181 = vmatprep.subr.bf16.mxu0 %v4004_v20  ;;  %v4201_v20 = vmov 1983009808  }
  0x78   : > { %1222 = vmatprep.subr.bf16.mxu1 %v4007_v21  ;;  %v436_v19 = vrot.slane %v431_v17, %v435_v16  ;;  %v1295_v21 = vunpack.c.l.s4 %v4201_v20 }
  0x7a   : > { %1182 = vmatpush1.bf16.msra.mxu0 %v4002_v22  ;;  %v440_v22 = vrot.slane %v431_v17, %v439_v18 }
  0x7b   : > { %1223 = vmatpush1.bf16.msra.mxu1 %v4005_v23  ;;  %1183 = vmatprep.subr.bf16.mxu0 %v4010_v24 }
  0x7c   : > { %1224 = vmatprep.subr.bf16.mxu1 %v4013_v25 }
  0x7e   : > { %1184 = vmatpush1.bf16.msra.mxu0 %v4008_v26 }
  0x7f   : > { %1225 = vmatpush1.bf16.msra.mxu1 %v4011_v27  ;;  %1185 = vmatprep.subr.bf16.mxu0 %v4016_v28 }
  0x80   : > { %1226 = vmatprep.subr.bf16.mxu1 %v4019_v29 }
  0x82   : > { %1186 = vmatpush1.bf16.msra.mxu0 %v4014_v30 }
  0x83   : > { %1227 = vmatpush1.bf16.msra.mxu1 %v4017_v31  ;;  %1187 = vmatprep.subr.bf16.mxu0 %v4022_v32 }
  0x84   : > { %1228 = vmatprep.subr.bf16.mxu1 %v4025_v33 }
  0x86   : > { %1188 = vmatpush1.bf16.msra.mxu0 %v4020_v34 }
  0x87   : > { %1229 = vmatpush1.bf16.msra.mxu1 %v4023_v35  ;;  %1189 = vmatprep.subr.bf16.mxu0 %v4028_v36 }
  0x88   : > { %1230 = vmatprep.subr.bf16.mxu1 %v4031_v37 }
  0x8a   : > { %1190 = vmatpush1.bf16.msra.mxu0 %v4026_v38 }
  0x8b   : > { %1231 = vmatpush1.bf16.msra.mxu1 %v4029_v39  ;;  %1191 = vmatprep.subr.bf16.mxu0 %v4034_v40 }
  0x8c   : > { %1232 = vmatprep.subr.bf16.mxu1 %v4037_v41 }
  0x8e   : > { %1192 = vmatpush1.bf16.msra.mxu0 %v4032_v42 }
  0x8f   : > { %1233 = vmatpush1.bf16.msra.mxu1 %v4035_v43  ;;  %1193 = vmatprep.subr.bf16.mxu0 %v4040_v44  ;;  %v443_v43 = vsub.s32 2, %v434_v15  ;;  %v447_v44 = vsub.s32 3, %v434_v15 }
  0x90   : > { %1234 = vmatprep.subr.bf16.mxu1 %v4043_v45 }
  0x91   : > { %v444_v45 = vrot.slane %v431_v17, %v443_v43 }
  0x92   : > { %1194 = vmatpush1.bf16.msra.mxu0 %v4038_v47  ;;  %v448_v47 = vrot.slane %v431_v17, %v447_v44 }
  0x93   : > { %1235 = vmatpush1.bf16.msra.mxu1 %v4041_v48  ;;  %1195 = vmatprep.subr.bf16.mxu0 %v4046_v49 }
  0x94   : > { %1236 = vmatprep.subr.bf16.mxu1 %v4049_v51 }
  0x96   : > { %1196 = vmatpush1.bf16.msra.mxu0 %v4044_v52 }
  0x97   : > { %1237 = vmatpush1.bf16.msra.mxu1 %v4047_v53  ;;  %1197 = vmatprep.subr.bf16.mxu0 %v4052_v54 }
  0x98   : > { %1238 = vmatprep.subr.bf16.mxu1 %v4055_v55 }
  0x9a   : > { %1198 = vmatpush1.bf16.msra.mxu0 %v4050_v56 }
  0x9b   : > { %1239 = vmatpush1.bf16.msra.mxu1 %v4053_v57  ;;  %1199 = vmatprep.subr.bf16.mxu0 %v4058_v58 }
  0x9c   : > { %1240 = vmatprep.subr.bf16.mxu1 %v4061_v59 }
  0x9e   : > { %1200 = vmatpush1.bf16.msra.mxu0 %v4056_v60 }
  0x9f   : > { %1241 = vmatpush1.bf16.msra.mxu1 %v4059_v61  ;;  %1201 = vmatprep.subr.bf16.mxu0 %v4064_v62 }
  0xa0   : > { %1242 = vmatprep.subr.bf16.mxu1 %v4067_v63 }
  0xa2   : > { %1202 = vmatpush1.bf16.msra.mxu0 %v4062_v0 }
  0xa3   : > { %1243 = vmatpush1.bf16.msra.mxu1 %v4065_v1  ;;  %1203 = vmatprep.subr.bf16.mxu0 %v4070_v2 }
  0xa4   : > { %1244 = vmatprep.subr.bf16.mxu1 %v4073_v3 }
  0xa6   : > { %1204 = vmatpush1.bf16.msra.mxu0 %v4068_v6 }
  0xa7   : > { %1245 = vmatpush1.bf16.msra.mxu1 %v4071_v7  ;;  %1205 = vmatprep.subr.bf16.mxu0 %v4076_v10 }
  0xa8   : > { %1246 = vmatprep.subr.bf16.mxu1 %v4079_v11 }
  0xaa   : > { %1206 = vmatpush1.bf16.msra.mxu0 %v4074_v12 }
  0xab   : > { %1247 = vmatpush1.bf16.msra.mxu1 %v4077_v13 }
  0xad   : > { %1208 = vmatmul.mubr.bf16.vlgmr.msra.gmra.mrb[4].mxu0 %v4323_v8  ;;  %v1296_v8 = vunpack.c.0.s8 %v1295_v21 }
  0xae   : > { %1249 = vmatmul.mubr.bf16.vlgmr.msra.gmra.mrb[4].mxu1 %v4327_v9 }
  0xaf   : > { %v4338_v35 = vsub.s32 %v1296_v8, %v434_v15 }
 0x140   : > { %v1127_v23 = vpop.f32.mrb[0].mxu0 }
 0x141   : > { %v1168_v24 = vpop.f32.mrb[0].mxu1  ;;  %v1128_v25 = vadd.f32 %v1127_v23, %v436_v19  ;;  %v1129_v26 = vpop.f32.mrb[1].mxu0 }
 0x142   : > { %v1170_v27 = vpop.f32.mrb[1].mxu1  ;;  %v1130_v28 = vadd.f32 %v1129_v26, %v440_v22  ;;  %v1131_v9 = vpop.f32.mrb[2].mxu0 }
 0x143   : > { %v1172_v29 = vpop.f32.mrb[2].mxu1  ;;  %v1169_v30 = vadd.f32 %v1168_v24, %v1128_v25  ;;  %v1132_v31 = vpop.f32.mrb[3].mxu0 }
 0x144   : > { %v1173_v32 = vpop.f32.mrb[3].mxu1  ;;  %v1171_v33 = vadd.f32 %v1170_v27, %v1130_v28 }
 0x145   : > { %v1257_v34 = vadd.f32 %v1169_v30, %v4316_v4 }
 0x146   : > { %v1258_v36 = vadd.f32 %v1171_v33, %v4303_v46 }
 0x147   : > { %v1261_v37 = vmax.f32 %v1257_v34, 0.0 }
 0x148   : > { %v1262_v38 = vmax.f32 %v1258_v36, 0.0 }
 0x149   : > { %1268 = vrot.lane.b32.xlu1 %v1261_v37, %s4202_s27  ;;  %1266 = vrot.lane.b32.xlu0 %v1261_v37, %s4203_s28  ;;  %v4344_v39 = vrot.slane %v1261_v37, %v4338_v35  ;;  %v1293_v7 = vcombine.high %v1261_v37, %v1261_v37 }
 0x14a   : > { %v4347_v40 = vrot.slane %v1262_v38, %v4338_v35  ;;  %v1357_v10 = vcombine.high %v1262_v38, %v1262_v38 }
 0x14b   : > { %v4353_v46 = vcombine.high %v4344_v39, %v4344_v39  ;;  %v4404_v11 = vrot.slane %v1293_v7, %v4338_v35  ;;  %v3700_v20 = vrot.slane %v4344_v39, 9 }
 0x14c   : > { %v4357_v4 = vcombine.high %v4347_v40, %v4347_v40  ;;  %v4408_v13 = vrot.slane %v1357_v10, %v4338_v35  ;;  %v3704_v33 = vrot.slane %v4347_v40, 9 }
 0x14d   : > { %1277 = vrot.lane.b32.xlu1 %v1262_v38, %s4204_s29  ;;  %1273 = vrot.lane.b32.xlu0 %v1262_v38, %s4203_s28  ;;  %v1732_v41 = vcombine.low %v4344_v39, %v4353_v46  ;;  %v1574_v12 = vrot.slane %v4353_v46, 7  ;;  %v1577_v16 = vrot.slane %v4404_v11, 7  ;;  %v1549_v17 = vcombine.high %v4404_v11, %v4404_v11 }
 0x14e   : > { %v1614_v14 = vrot.slane %v4357_v4, 7  ;;  %v1553_v18 = vcombine.high %v4408_v13, %v4408_v13  ;;  %v1617_v19 = vrot.slane %v4408_v13, 7  ;;  %v2188_v22 = vcombine.low %v4353_v46, %v4404_v11 }
 0x14f   : > { %v1576_v15 = vrot.slane %v1574_v12, 2  ;;  %v2239_v25 = vcombine.low %v4357_v4, %v4408_v13  ;;  %v4428_v26 = vrot.slane %v1577_v16, 2  ;;  %v4430_v27 = vrot.slane %v1549_v17, 7 }
 0x150   : > { %v1616_v23 = vrot.slane %v1614_v14, 2  ;;  %v4432_v8 = vrot.slane %v1617_v19, 2  ;;  %v4434_v28 = vrot.slane %v1553_v18, 7  ;;  %v1575_v9 = vsel %vm4418_vm6, %v3700_v20, %v1574_v12 }
 0x151   : > { %1275 = vrot.lane.b32.xlu0 %v1262_v38, %s4202_s27  ;;  %v1578_v24 = vsel %vm4418_vm6, %v1576_v15, %v1577_v16  ;;  %v4439_v32 = vrot.slane %v2188_v22, %v4338_v35 }
 0x152   : > { %v1948_v31 = vcombine.low %v1575_v9, %v1578_v24  ;;  %v4444_v34 = vsel %vm4418_vm6, %v1616_v23, %v1617_v19 }
 0x180   : > { %v1209_v48 = vpop.f32.mrb[4].mxu0 }
 0x181   : > { %v1250_v49 = vpop.f32.mrb[4].mxu1  ;;  %v1210_v51 = vadd.f32 %v1209_v48, %v444_v45  ;;  %v1211_v52 = vpop.f32.mrb[5].mxu0  ;;  %v4456_v45 = vsel %vm4418_vm6, %v3704_v33, %v1614_v14  ;;  %v4463_v48 = vrot.slane %v2239_v25, %v4338_v35 }
 0x182   : > { %v1252_v53 = vpop.f32.mrb[5].mxu1  ;;  %v1212_v54 = vadd.f32 %v1211_v52, %v448_v47  ;;  %v1213_v55 = vpop.f32.mrb[6].mxu0  ;;  %v5693_v47 = vsel %vm4418_vm6, %v4428_v26, %v4430_v27 }
 0x183   : > { %v1254_v56 = vpop.f32.mrb[6].mxu1  ;;  %v1251_v57 = vadd.f32 %v1250_v49, %v1210_v51  ;;  %v1214_v58 = vpop.f32.mrb[7].mxu0 }
 0x184   : > { %v1255_v59 = vpop.f32.mrb[7].mxu1  ;;  %v1253_v60 = vadd.f32 %v1252_v53, %v1212_v54  ;;  %v4479_v58 = vrot.slane %v1948_v31, %v4338_v35 }
 0x185   : > { %v1259_v61 = vadd.f32 %v1251_v57, %v4319_v5  ;;  %v4485_v59 = vrot.slane %v1732_v41, %v4338_v35 }
 0x186   : > { %v1260_v62 = vadd.f32 %v1253_v60, %v4310_v50 }
 0x187   : > { %v4366_v63 = vmax.f32 %v1259_v61, 0.0  ;;  %5690 = vst [vmem:[#allocation9_spill] sm:$0xff] %v4485_v59 }
 0x188   : > { %v4368_v0 = vmax.f32 %v1260_v62, 0.0 }
 0x189   : > { %v4372_v1 = vrot.slane %v4366_v63, %v4338_v35  ;;  %1280 = vrot.lane.b32.xlu1 %v4366_v63, %s4203_s28  ;;  %1282 = vrot.lane.b32.xlu0 %v4366_v63, %s4202_s27 }
 0x18a   : > { %v4380_v2 = vrot.slane %v4368_v0, %v4338_v35 }
 0x18b   : > { %5684 = vst [vmem:[#allocation5_spill] sm:$0xff] %v4372_v1  ;;  %v4388_v50 = vcombine.high %v4372_v1, %v4372_v1 }
 0x18c   : > { %5685 = vst [vmem:[#allocation6_spill] sm:$0xff] %v4380_v2  ;;  %v4392_v5 = vcombine.high %v4380_v2, %v4380_v2 }
 0x18d   : > { %1284 = vrot.lane.b32.xlu1 %v4366_v63, %s4204_s29  ;;  %1287 = vrot.lane.b32.xlu0 %v4368_v0, %s4203_s28  ;;  %5686 = vst [vmem:[#allocation7_spill] sm:$0xff] %v4388_v50 }
 0x18e   : > { %5687 = vst [vmem:[#allocation8_spill] sm:$0xff] %v4392_v5 }
 0x191   : > { %1289 = vrot.lane.b32.xlu1 %v4368_v0, %s4202_s27  ;;  %1291 = vrot.lane.b32.xlu0 %v4368_v0, %s4204_s29 }
 0x195   : > { %1270 = vrot.lane.b32.xlu1 %v1261_v37, %s4204_s29 }
 0x1bb   : > { %v1269_v29 = vpop.permute.xlu1 %1268  ;;  %v1267_v30 = vpop.permute.xlu0 %1266 }
 0x1bc   : > { %v1325_v36 = vcombine.high %v1269_v29, %v1269_v29  ;;  %v1332_v37 = vrot.slane %v1269_v29, %v4338_v35  ;;  %v1309_v38 = vcombine.high %v1267_v30, %v1267_v30  ;;  %v4448_v43 = vrot.slane %v1267_v30, %v4338_v35 }
 0x1be   : > { %v4465_v49 = vcombine.high %v1332_v37, %v1332_v37  ;;  %v3702_v51 = vrot.slane %v1332_v37, 9  ;;  %v4468_v52 = vrot.slane %v1309_v38, %v4338_v35  ;;  %v4474_v54 = vcombine.high %v4448_v43, %v4448_v43 }
 0x1bf   : > { %v1733_v55 = vcombine.low %v4404_v11, %v4448_v43  ;;  %v1278_v56 = vpop.permute.xlu1 %1277  ;;  %v1274_v57 = vpop.permute.xlu0 %1273  ;;  %v4488_v60 = vrot.slane %v1325_v36, %v4338_v35  ;;  %v3701_v10 = vrot.slane %v4448_v43, 9 }
 0x1c0   : > { %v1594_v61 = vrot.slane %v4465_v49, 7  ;;  %v1750_v62 = vcombine.low %v1332_v37, %v4465_v49  ;;  %v1587_v7 = vrot.slane %v4468_v52, 7  ;;  %v1584_v12 = vrot.slane %v4474_v54, 7 }
 0x1c1   : > { %v1405_v15 = vcombine.high %v1278_v56, %v1278_v56  ;;  %v4503_v46 = vcombine.high %v4468_v52, %v4468_v52  ;;  %v4506_v41 = vrot.slane %v1733_v55, %v4338_v35  ;;  %v4514_v19 = vrot.slane %v1278_v56, %v4338_v35 }
 0x1c2   : > { %v4499_v39 = vsel %vm4418_vm6, %v3702_v51, %v1594_v61  ;;  %v1596_v17 = vrot.slane %v1594_v61, 2  ;;  %v4511_v18 = vrot.slane %v1750_v62, %v4338_v35  ;;  %v1586_v23 = vrot.slane %v1584_v12, 2 }
 0x1c3   : > { %5691 = vst [vmem:[#allocation10_spill] sm:$0xff] %v4506_v41  ;;  %v4517_v20 = vrot.slane %v1405_v15, %v4338_v35  ;;  %v1276_v22 = vpop.permute.xlu0 %1275  ;;  %v1589_v24 = vrot.slane %v1587_v7, 2  ;;  %v1373_v25 = vcombine.high %v1274_v57, %v1274_v57  ;;  %v4520_v9 = vrot.slane %v1274_v57, %v4338_v35 }
 0x1c4   : > { %5692 = vst [vmem:[#allocation11_spill] sm:$0xff] %v4511_v18  ;;  %v4524_v29 = vcombine.high %v4514_v19, %v4514_v19  ;;  %v1389_v33 = vcombine.high %v1276_v22, %v1276_v22  ;;  %v1590_v36 = vrot.slane %v4503_v46, 7  ;;  %v1396_v51 = vrot.slane %v1276_v22, %v4338_v35 }
 0x1c5   : > { %v4528_v30 = vcombine.high %v4517_v20, %v4517_v20  ;;  %v1647_v31 = vrot.slane %v4517_v20, 7  ;;  %v1387_v37 = vrot.slane %v1373_v25, %v4338_v35  ;;  %v4535_v38 = vcombine.high %v4520_v9, %v4520_v9 }
 0x1c6   : > { %v5644_v56 = vrot.slane %v4524_v29, 7  ;;  %v4549_v53 = vrot.slane %v1389_v33, %v4338_v35  ;;  %v1404_v61 = vcombine.high %v1396_v51, %v1396_v51  ;;  %v1585_v16 = vsel %vm4418_vm6, %v3701_v10, %v1584_v12 }
 0x1c7   : > { %v1554_v62 = vcombine.high %v1387_v37, %v1387_v37  ;;  %v5647_v15 = vrot.slane %v4535_v38, 7  ;;  %v1627_v6 = vrot.slane %v1387_v37, 7  ;;  %v1649_v3 = vrot.slane %v1647_v31, 2 }
 0x1c8   : > { %v1650_v42 = vrot.slane %v4528_v30, 7  ;;  %v1800_v22 = vcombine.low %v4535_v38, %v1387_v37  ;;  %v1646_v57 = vrot.slane %v5644_v56, 2  ;;  %v1588_v44 = vsel %vm4418_vm6, %v1586_v23, %v1587_v7 }
 0x1c9   : > { %v1626_v14 = vrot.slane %v5647_v15, 2  ;;  %v1629_v55 = vrot.slane %v1627_v6, 2  ;;  %v1630_v25 = vrot.slane %v1554_v62, 7  ;;  %v1634_v33 = vrot.slane %v1404_v61, 7 }
 0x1ca   : > { %v1801_v2 = vcombine.low %v1396_v51, %v1404_v61  ;;  %v1591_v56 = vsel %vm4418_vm6, %v1589_v24, %v1590_v36  ;;  %v1597_v1 = vrot.slane %v4488_v60, 7  ;;  %v1949_v15 = vcombine.low %v5693_v47, %v1585_v16 }
 0x1cb   : > { %v1965_v5 = vcombine.low %v1588_v44, %v1591_v56  ;;  %v2256_v50 = vcombine.low %v1387_v37, %v1554_v62  ;;  %v2257_v10 = vcombine.low %v1404_v61, %v4549_v53  ;;  %v4571_v12 = vrot.slane %v1800_v22, %v4338_v35 }
 0x1cc   : > { %v3706_v7 = vrot.slane %v1396_v51, 9  ;;  %v4574_v23 = vrot.slane %v1801_v2, %v4338_v35  ;;  %v1598_v24 = vsel %vm4418_vm6, %v1596_v17, %v1597_v1  ;;  %v1963_v36 = vrot.slane %v1949_v15, %v4338_v35 }
 0x1cd   : > { %5694 = vst [vmem:[#allocation12_spill] sm:$0xff] %v4571_v12  ;;  %v1966_v26 = vcombine.low %v4499_v39, %v1598_v24  ;;  %v1973_v27 = vrot.slane %v1965_v5, %v4338_v35  ;;  %v2264_v44 = vrot.slane %v2256_v50, %v4338_v35  ;;  %v2271_v16 = vrot.slane %v2257_v10, %v4338_v35 }
 0x1ce   : > { %5695 = vst [vmem:[#allocation13_spill] sm:$0xff] %v4574_v23  ;;  %v3719_v2 = vcombine.high %v4549_v53, %v4514_v19  ;;  %v2274_v37 = vcombine.low %v4517_v20, %v4528_v30  ;;  %v1636_v17 = vrot.slane %v1634_v33, 2  ;;  %v1555_v39 = vcombine.high %v4549_v53, %v4549_v53 }
 0x1cf   : > { %v1980_v51 = vrot.slane %v1966_v26, %v4338_v35  ;;  %v1628_v50 = vsel %vm4418_vm6, %v1626_v14, %v1627_v6  ;;  %v4596_v5 = vcombine.low %v2264_v44, %v2271_v16  ;;  %v1631_v62 = vsel %vm4418_vm6, %v1629_v55, %v1630_v25 }
 0x1d0   : > { %v2281_v56 = vrot.slane %v3719_v2, %v4338_v35  ;;  %v2288_v61 = vrot.slane %v2274_v37, %v4338_v35  ;;  %v1964_v30 = vcombine.low %v4479_v58, %v1963_v36  ;;  %v1637_v22 = vrot.slane %v4549_v53, 7 }
 0x1d1   : > { %5696 = vst [vmem:[#allocation14_spill] sm:$0xff] %v4596_v5  ;;  %v1981_v15 = vcombine.low %v1973_v27, %v1980_v51  ;;  %v1640_v10 = vrot.slane %v1555_v39, 7  ;;  %v1648_v6 = vsel %vm4418_vm6, %v1646_v57, %v1647_v31  ;;  %v1651_v14 = vsel %vm4418_vm6, %v1649_v3, %v1650_v42 }
 0x1d2   : > { %v4604_v24 = vcombine.low %v2281_v56, %v2288_v61  ;;  %v2016_v26 = vcombine.low %v1628_v50, %v1631_v62  ;;  %v1635_v44 = vsel %vm4418_vm6, %v3706_v7, %v1634_v33  ;;  %v1638_v58 = vsel %vm4418_vm6, %v1636_v17, %v1637_v22 }
 0x1d3   : > { %v3833_v16 = vpack.i.bf16 %v1981_v15, %v1964_v30  ;;  %v1639_v55 = vrot.slane %v1637_v22, 2  ;;  %v2017_v36 = vcombine.low %v1635_v44, %v1638_v58  ;;  %v2034_v27 = vcombine.low %v1648_v6, %v1651_v14  ;;  %v4081_v30 = vld [vmem:[%s5635_s3 + $0x8] sm:$0xff]  }
 0x1d4   : > { %5697 = vst [vmem:[#allocation15_spill] sm:$0xff] %v4604_v24  ;;  %v3828_v25 = vpack.i.bf16 %v4604_v24, %v4596_v5  ;;  %v5698_v31 = vcombine.high %v4404_v11, %v4448_v43  ;;  %v5699_v3 = vrot.slane %v4524_v29, 7  ;;  %v5700_v33 = vrot.slane %v4514_v19, 9 }
 0x1d5   : > { %3834 = vrot.lane.b32.xlu1 %v3833_v16, %s4204_s29  ;;  %v1641_v42 = vsel %vm4418_vm6, %v1639_v55, %v1640_v10  ;;  %v2205_v2 = vcombine.low %v4468_v52, %v4503_v46  ;;  %v2206_v37 = vcombine.low %v4465_v49, %v4488_v60  ;;  %v2024_v11 = vrot.slane %v2016_v26, %v4338_v35 }
 0x1d6   : > { %v2203_v57 = vrot.slane %v5698_v31, %v4338_v35  ;;  %v1645_v7 = vsel %vm4418_vm6, %v5700_v33, %v5699_v3  ;;  %3829 = vrot.lane.b32.xlu0 %v3828_v25, %s4202_s27  ;;  %v2031_v43 = vrot.slane %v2017_v36, %v4338_v35  ;;  %v5702_v39 = vcombine.low %v4408_v13, %v4520_v9  ;;  %v5719_v33 = vld [vmem:[#allocation8_spill] sm:$0xff] }
 0x1d7   : > { %v2033_v17 = vcombine.low %v1641_v42, %v1645_v7  ;;  %v2213_v46 = vrot.slane %v2205_v2, %v4338_v35  ;;  %v2220_v49 = vrot.slane %v2206_v37, %v4338_v35  ;;  %v5704_v56 = vrot.slane %v4535_v38, 7  ;;  %v5718_v42 = vld [vmem:[#allocation7_spill] sm:$0xff] }
 0x1d8   : > { %v4637_v51 = vcombine.low %v4439_v32, %v2203_v57  ;;  %v4643_v50 = vrot.slane %v5702_v39, %v4338_v35  ;;  %v5705_v61 = vrot.slane %v4520_v9, 9  ;;  %v4080_v32 = vld [vmem:[%s5635_s3] sm:$0xff]   ;;  %v2032_v15 = vcombine.low %v2024_v11, %v2031_v43 }
 0x1d9   : > { %v2041_v22 = vrot.slane %v2033_v17, %v4338_v35  ;;  %v2048_v10 = vrot.slane %v2034_v27, %v4338_v35  ;;  %v5706_v38 = vsel %vm4418_vm6, %v4432_v8, %v4434_v28  ;;  %v4666_v14 = vcombine.low %v2213_v46, %v2220_v49  ;;  %3791 = vmatprep.subr.bf16.mxu1 %v4080_v32  ;;  %v5720_v46 = vld [vmem:[#allocation5_spill] sm:$0xff] }
 0x1da   : > { %5701 = vst [vmem:[#allocation16_spill] sm:$0xff] %v4637_v51  ;;  %5703 = vst [vmem:[#allocation17_spill] sm:$0xff] %v4643_v50  ;;  %v1625_v62 = vsel %vm4418_vm6, %v5705_v61, %v5704_v56  ;;  %v5708_v26 = vcombine.high %v4408_v13, %v4520_v9  ;;  %v5709_v58 = vcombine.low %v4474_v54, %v4468_v52  ;;  %3797 = vmatpush3.bf16.msra.mxu1 %v4080_v32  ;;  %v4082_v54 = vld [vmem:[%s5635_s3 + $0x10] sm:$0xff]   ;;  %v5721_v61 = vld [vmem:[#allocation6_spill] sm:$0xff] }
 0x1db   : > { %v2000_v6 = vcombine.low %v5706_v38, %v1625_v62  ;;  %5707 = vst [vmem:[#allocation18_spill] sm:$0xff] %v4666_v14  ;;  %v2049_v25 = vcombine.low %v2041_v22, %v2048_v10  ;;  %v5711_v8 = vcombine.low %v4456_v45, %v4444_v34  ;;  %v1817_v13 = vcombine.low %v4549_v53, %v4514_v19 }
 0x1dc   : > { %v2254_v44 = vrot.slane %v5708_v26, %v4338_v35  ;;  %v4678_v55 = vrot.slane %v5709_v58, %v4338_v35  ;;  %3792 = vmatprep.subr.bf16.mxu1 %v4081_v30  ;;  %v5713_v34 = vcombine.low %v4347_v40, %v4357_v4  ;;  %v5716_v19 = vcombine.low %v4524_v29, %v4517_v20  ;;  %v4083_v4 = vld [vmem:[%s5635_s3 + $0x18] sm:$0xff]  }
 0x1dd   : > { %v2007_v28 = vrot.slane %v5711_v8, %v4338_v35  ;;  %v2014_v36 = vrot.slane %v2000_v6, %v4338_v35  ;;  %v3838_v27 = vpack.i.bf16 %v2049_v25, %v2032_v15  ;;  %3767 = vmatprep.subr.bf16.mxu0 %v4080_v32  ;;  %v1421_v20 = vcombine.high %v4366_v63, %v4366_v63 }
 0x1de   : > { %5710 = vst [vmem:[#allocation19_spill] sm:$0xff] %v4678_v55  ;;  %v4688_v9 = vcombine.low %v4463_v48, %v2254_v44  ;;  %v4699_v45 = vrot.slane %v5713_v34, %v4338_v35  ;;  %v4704_v48 = vrot.slane %v1817_v13, %v4338_v35  ;;  %v4710_v31 = vrot.slane %v5716_v19, %v4338_v35 }
 0x1df   : > { %v4701_v53 = vcombine.low %v2007_v28, %v2014_v36  ;;  %3768 = vmatpush3.bf16.msra.mxu0 %v4080_v32  ;;  %3839 = vrot.lane.b32.xlu0 %v3838_v27, %s4204_s29  ;;  %v1485_v29 = vcombine.high %v4368_v0, %v4368_v0  ;;  %v1654_v3 = vrot.slane %v5718_v42, 7  ;;  %v1694_v7 = vrot.slane %v5719_v33, 7 }
 0x1e0   : > { %5712 = vst [vmem:[#allocation20_spill] sm:$0xff] %v4688_v9  ;;  %5714 = vst [vmem:[#allocation21_spill] sm:$0xff] %v4699_v45  ;;  %3798 = vmatpush3.bf16.msra.mxu1 %v4081_v30  ;;  %3769 = vmatprep.subr.bf16.mxu0 %v4081_v30  ;;  %v4727_v2 = vrot.slane %v1421_v20, %v4338_v35  ;;  %v3708_v49 = vrot.slane %v5720_v46, 9  ;;  %v3712_v62 = vrot.slane %v5721_v61, 9  ;;  %v4770_v34 = vrot.slane %v1597_v1, 2 }
 0x1e1   : > { %5715 = vst [vmem:[#allocation22_spill] sm:$0xff] %v4704_v48  ;;  %5717 = vst [vmem:[#allocation23_spill] sm:$0xff] %v4710_v31  ;;  %3793 = vmatprep.subr.bf16.mxu1 %v4082_v54  ;;  %v4730_v37 = vrot.slane %v1485_v29, %v4338_v35  ;;  %v1656_v11 = vrot.slane %v1654_v3, 2  ;;  %v1696_v43 = vrot.slane %v1694_v7, 2  ;;  %v1551_v15 = vcombine.high %v4488_v60, %v4488_v60  ;;  %v4084_v48 = vld [vmem:[%s5635_s3 + $0x20] sm:$0xff]  }
 0x1e2   : > { %v1557_v17 = vcombine.high %v4727_v2, %v4727_v2  ;;  %v1657_v63 = vrot.slane %v4727_v2, 7  ;;  %v2290_v32 = vcombine.low %v5718_v42, %v4727_v2  ;;  %v1655_v10 = vsel %vm4418_vm6, %v3708_v49, %v1654_v3 }
 0x1e3   : > { %3770 = vmatpush3.bf16.msra.mxu0 %v4081_v30  ;;  %v1561_v0 = vcombine.high %v4730_v37, %v4730_v37  ;;  %v1697_v39 = vrot.slane %v4730_v37, 7  ;;  %v2341_v30 = vcombine.low %v5719_v33, %v4730_v37  ;;  %v1695_v44 = vsel %vm4418_vm6, %v3712_v62, %v1694_v7 }
 0x1e4   : > { %3799 = vmatpush3.bf16.msra.mxu1 %v4082_v54  ;;  %3771 = vmatprep.subr.bf16.mxu0 %v4082_v54  ;;  %v1658_v56 = vsel %vm4418_vm6, %v1656_v11, %v1657_v63  ;;  %v4752_v38 = vrot.slane %v1657_v63, 2  ;;  %v4754_v6 = vrot.slane %v1557_v17, 7  ;;  %v4763_v13 = vrot.slane %v2290_v32, %v4338_v35 }
 0x1e5   : > { %3794 = vmatprep.subr.bf16.mxu1 %v4083_v4  ;;  %v1698_v22 = vsel %vm4418_vm6, %v1696_v43, %v1697_v39  ;;  %v2050_v26 = vcombine.low %v1655_v10, %v1658_v56  ;;  %v4758_v58 = vrot.slane %v1697_v39, 2  ;;  %v4760_v25 = vrot.slane %v1561_v0, 7 }
 0x1e6   : > { %v2101_v8 = vcombine.low %v1695_v44, %v1698_v22  ;;  %v4772_v27 = vrot.slane %v1551_v15, 7  ;;  %v5722_v7 = vcombine.low %v5720_v46, %v5718_v42  ;;  %v5724_v43 = vcombine.low %v5721_v61, %v5719_v33 }
 0x1e7   : > { %3772 = vmatpush3.bf16.msra.mxu0 %v4082_v54  ;;  %v4766_v54 = vrot.slane %v2341_v30, %v4338_v35  ;;  %v4783_v3 = vrot.slane %v2050_v26, %v4338_v35 }
 0x1e8   : > { %3800 = vmatpush3.bf16.msra.mxu1 %v4083_v4  ;;  %3773 = vmatprep.subr.bf16.mxu0 %v4083_v4  ;;  %v4793_v11 = vrot.slane %v5722_v7, %v4338_v35  ;;  %v4799_v17 = vrot.slane %v5724_v43, %v4338_v35  ;;  %v4809_v49 = vrot.slane %v2101_v8, %v4338_v35 }
 0x1e9   : > { %3795 = vmatprep.subr.bf16.mxu1 %v4084_v48 }
 0x1ea   : > { %5723 = vst [vmem:[#allocation7_spill] sm:$0xff] %v4793_v11  ;;  %5725 = vst [vmem:[#allocation8_spill] sm:$0xff] %v4799_v17 }
 0x1eb   : > { %3774 = vmatpush3.bf16.msra.mxu0 %v4083_v4 }
 0x1ec   : > { %3775 = vmatprep.subr.bf16.mxu0 %v4084_v48  ;;  %3801 = vmatpush3.bf16.msra.mxu1 %v4084_v48 }
 0x1ef   : > { %3776 = vmatpush3.bf16.msra.mxu0 %v4084_v48 }
 0x1fb   : > { %v1281_v28 = vpop.permute.xlu1 %1280  ;;  %v1283_v36 = vpop.permute.xlu0 %1282 }
 0x1fc   : > { %v1437_v19 = vcombine.high %v1281_v28, %v1281_v28  ;;  %v4775_v4 = vrot.slane %v1281_v28, %v4338_v35  ;;  %v1460_v20 = vrot.slane %v1283_v36, %v4338_v35  ;;  %v1453_v39 = vcombine.high %v1283_v36, %v1283_v36 }
 0x1fe   : > { %v4802_v63 = vrot.slane %v1437_v19, %v4338_v35  ;;  %v4806_v0 = vcombine.high %v4775_v4, %v4775_v4  ;;  %v1835_v42 = vcombine.low %v4727_v2, %v4775_v4  ;;  %v4813_v46 = vcombine.high %v1460_v20, %v1460_v20 }
 0x1ff   : > { %v1285_v56 = vpop.permute.xlu1 %1284  ;;  %v4834_v8 = vrot.slane %v1453_v39, %v4338_v35  ;;  %v3710_v28 = vrot.slane %v1460_v20, 9  ;;  %v1288_v7 = vpop.permute.xlu0 %1287 }
 0x200   : > { %v5653_v32 = vrot.slane %v4806_v0, 7  ;;  %v5652_v30 = vrot.slane %v4802_v63, 7  ;;  %v4828_v22 = vcombine.high %v4802_v63, %v4802_v63  ;;  %v1851_v10 = vcombine.low %v4806_v0, %v4802_v63 }
 0x201   : > { %v1852_v26 = vcombine.low %v1460_v20, %v4813_v46  ;;  %v1469_v44 = vcombine.high %v1285_v56, %v1285_v56  ;;  %v1674_v36 = vrot.slane %v4813_v46, 7  ;;  %v4838_v19 = vrot.slane %v1285_v56, %v4338_v35 }
 0x202   : > { %v4842_v43 = vrot.slane %v5653_v32, 2  ;;  %v4845_v57 = vrot.slane %v1835_v42, %v4338_v35  ;;  %v4848_v16 = vrot.slane %v1851_v10, %v4338_v35  ;;  %v4855_v20 = vrot.slane %v5652_v30, 2 }
 0x203   : > { %v4851_v39 = vrot.slane %v1852_v26, %v4338_v35  ;;  %v4858_v56 = vrot.slane %v1469_v44, %v4338_v35  ;;  %v4862_v52 = vcombine.high %v4838_v19, %v4838_v19  ;;  %v1868_v42 = vcombine.low %v4834_v8, %v4838_v19  ;;  %v1290_v33 = vpop.permute.xlu1 %1289  ;;  %v1292_v26 = vpop.permute.xlu0 %1291 }
 0x204   : > { %5726 = vst [vmem:[#allocation5_spill] sm:$0xff] %v4845_v57  ;;  %5727 = vst [vmem:[#allocation6_spill] sm:$0xff] %v4848_v16  ;;  %v1501_v47 = vcombine.high %v1288_v7, %v1288_v7  ;;  %v4870_v40 = vrot.slane %v1288_v7, %v4338_v35  ;;  %v4874_v44 = vsel %vm4418_vm6, %v3710_v28, %v1674_v36  ;;  %v4876_v1 = vrot.slane %v1674_v36, 2 }
 0x205   : > { %5728 = vst [vmem:[#allocation24_spill] sm:$0xff] %v4851_v39  ;;  %v5660_v61 = vrot.slane %v4862_v52, 7  ;;  %v4883_v10 = vcombine.high %v4858_v56, %v4858_v56  ;;  %v4895_v30 = vrot.slane %v1868_v42, %v4338_v35  ;;  %v1517_v24 = vcombine.high %v1290_v33, %v1290_v33 }
 0x206   : > { %v4887_v7 = vrot.slane %v1501_v47, %v4338_v35  ;;  %v4891_v28 = vcombine.high %v4870_v40, %v4870_v40  ;;  %v1886_v62 = vcombine.low %v4730_v37, %v4870_v40  ;;  %v1524_v5 = vrot.slane %v1290_v33, %v4338_v35 }
 0x207   : > { %5729 = vst [vmem:[#allocation25_spill] sm:$0xff] %v4895_v30  ;;  %v4911_v42 = vrot.slane %v5660_v61, 2  ;;  %v5730_v50 = vrot.slane %v4858_v56, 7  ;;  %v3722_v41 = vcombine.high %v4730_v37, %v4870_v40  ;;  %v1271_v59 = vpop.permute.xlu1 %1270  ;;  %v4930_v29 = vrot.slane %v1517_v24, %v4338_v35 }
 0x208   : > { %v4903_v32 = vcombine.high %v4887_v7, %v4887_v7  ;;  %v1902_v36 = vcombine.low %v4891_v28, %v4887_v7  ;;  %v4921_v15 = vrot.slane %v1886_v62, %v4338_v35  ;;  %v5732_v61 = vrot.slane %v4891_v28, 7 }
 0x209   : > { %v4917_v45 = vrot.slane %v5730_v50, 2  ;;  %v4932_v33 = vcombine.high %v1524_v5, %v1524_v5  ;;  %v1533_v50 = vcombine.high %v1292_v26, %v1292_v26  ;;  %v5734_v55 = vrot.slane %v4887_v7, 7 }
 0x20a   : > { %5731 = vst [vmem:[#allocation26_spill] sm:$0xff] %v4921_v15  ;;  %v4927_v18 = vrot.slane %v5732_v61, 2  ;;  %v4940_v39 = vrot.slane %v1902_v36, %v4338_v35  ;;  %v4943_v37 = vrot.slane %v1292_v26, %v4338_v35  ;;  %v1341_v16 = vcombine.high %v1271_v59, %v1271_v59 }
 0x20b   : > { %5733 = vst [vmem:[#allocation27_spill] sm:$0xff] %v4932_v33  ;;  %v4936_v47 = vrot.slane %v5734_v55, 2  ;;  %v1903_v61 = vcombine.low %v1524_v5, %v4932_v33  ;;  %v4947_v24 = vrot.slane %v1533_v50, %v4338_v35  ;;  %v4950_v23 = vrot.slane %v1271_v59, %v4338_v35 }
 0x20c   : > { %5735 = vst [vmem:[#allocation28_spill] sm:$0xff] %v4940_v39  ;;  %v3714_v12 = vrot.slane %v1524_v5, 9  ;;  %v1714_v55 = vrot.slane %v4932_v33, 7  ;;  %v4955_v62 = vcombine.high %v4943_v37, %v4943_v37  ;;  %v5737_v59 = vcombine.high %v4727_v2, %v4775_v4 }
 0x20d   : > { %v4960_v36 = vrot.slane %v1903_v61, %v4338_v35  ;;  %v4964_v50 = vcombine.high %v4947_v24, %v4947_v24  ;;  %v2307_v31 = vcombine.low %v4802_v63, %v4828_v22  ;;  %v4985_v15 = vrot.slane %v1341_v16, %v4338_v35 }
 0x20e   : > { %v2305_v5 = vrot.slane %v5737_v59, %v4338_v35  ;;  %v5672_v26 = vrot.slane %v4955_v62, 7  ;;  %v4989_v9 = vcombine.high %v4950_v23, %v4950_v23  ;;  %v4993_v30 = vsel %vm4418_vm6, %v3714_v12, %v1714_v55 }
 0x20f   : > { %5736 = vst [vmem:[#allocation29_spill] sm:$0xff] %v4960_v36  ;;  %5739 = vst [vmem:[#allocation31_spill] sm:$0xff] %v4993_v30  ;;  %v4995_v61 = vrot.slane %v1714_v55, 2  ;;  %v1552_v16 = vcombine.high %v4985_v15, %v4985_v15  ;;  %v1607_v36 = vrot.slane %v4985_v15, 7  ;;  %v5740_v55 = vrot.slane %v4947_v24, 7 }
 0x210   : > { %5738 = vst [vmem:[#allocation30_spill] sm:$0xff] %v4989_v9  ;;  %v4999_v2 = vrot.slane %v5672_v26, 2  ;;  %v1604_v59 = vrot.slane %v4989_v9, 7  ;;  %v3703_v26 = vrot.slane %v4950_v23, 9  ;;  %v2308_v48 = vcombine.low %v4813_v46, %v4834_v8 }
 0x211   : > { %v5010_v39 = vrot.slane %v5740_v55, 2  ;;  %v1609_v57 = vrot.slane %v1607_v36, 2  ;;  %v1610_v51 = vrot.slane %v1552_v16, 7  ;;  %v2315_v14 = vrot.slane %v2307_v31, %v4338_v35 }
 0x212   : > { %v1606_v11 = vrot.slane %v1604_v59, 2  ;;  %v2322_v33 = vrot.slane %v2308_v48, %v4338_v35  ;;  %v5741_v12 = vrot.slane %v4806_v0, 7  ;;  %v5742_v55 = vrot.slane %v4775_v4, 9 }
 0x213   : > { %v5743_v30 = vrot.slane %v4802_v63, 7  ;;  %v5744_v17 = vrot.slane %v4828_v22, 7  ;;  %v1677_v48 = vrot.slane %v4834_v8, 7  ;;  %v5745_v4 = vsel %vm4418_vm6, %v4752_v38, %v4754_v6 }
 0x214   : > { %v1665_v9 = vsel %vm4418_vm6, %v5742_v55, %v5741_v12  ;;  %v2325_v63 = vcombine.low %v4858_v56, %v4883_v10  ;;  %v5046_v22 = vcombine.low %v2315_v14, %v2322_v33  ;;  %v4085_v14 = vld [vmem:[%s5635_s3 + $0x28] sm:$0xff]   ;;  %v1611_v55 = vsel %vm4418_vm6, %v1609_v57, %v1610_v51 }
 0x215   : > { %v1668_v46 = vsel %vm4418_vm6, %v4842_v43, %v5743_v30  ;;  %v1671_v31 = vsel %vm4418_vm6, %v4855_v20, %v5744_v17  ;;  %v2051_v0 = vcombine.low %v5745_v4, %v1665_v9  ;;  %v5044_v30 = vcombine.low %v4763_v13, %v2305_v5  ;;  %3796 = vmatprep.subr.bf16.mxu1 %v4085_v14 }
 0x216   : > { %v2067_v12 = vcombine.low %v1668_v46, %v1671_v31  ;;  %v2356_v43 = vrot.slane %v3722_v41, %v4338_v35  ;;  %v1605_v17 = vsel %vm4418_vm6, %v3703_v26, %v1604_v59  ;;  %v3717_v20 = vcombine.high %v4488_v60, %v4950_v23  ;;  %3802 = vmatpush3.bf16.msra.mxu1 %v4085_v14 }
 0x217   : > { %v1678_v9 = vsel %vm4418_vm6, %v4876_v1, %v1677_v48  ;;  %v2065_v38 = vrot.slane %v2051_v0, %v4338_v35  ;;  %v2339_v6 = vrot.slane %v2325_v63, %v4338_v35  ;;  %v3843_v41 = vpack.i.bf16 %v5046_v22, %v5044_v30  ;;  %3777 = vmatprep.subr.bf16.mxu0 %v4085_v14 }
 0x218   : > { %v2068_v13 = vcombine.low %v4874_v44, %v1678_v9  ;;  %v2075_v33 = vrot.slane %v2067_v12, %v4338_v35  ;;  %v1608_v26 = vsel %vm4418_vm6, %v1606_v11, %v1607_v36  ;;  %v5746_v1 = vcombine.high %v4834_v8, %v4838_v19  ;;  %3778 = vmatpush3.bf16.msra.mxu0 %v4085_v14 }
 0x219   : > { %v5072_v59 = vcombine.low %v4766_v54, %v2356_v43  ;;  %v5747_v44 = vsel %vm4418_vm6, %v4770_v34, %v4772_v27  ;;  %3844 = vrot.lane.b32.xlu1 %v3843_v41, %s4202_s27  ;;  %v2066_v11 = vcombine.low %v4783_v3, %v2065_v38  ;;  %v1983_v31 = vcombine.low %v1608_v26, %v1611_v55 }
 0x21a   : > { %v2332_v5 = vrot.slane %v5746_v1, %v4338_v35  ;;  %v1982_v46 = vcombine.low %v5747_v44, %v1605_v17  ;;  %v2082_v36 = vrot.slane %v2068_v13, %v4338_v35  ;;  %v2223_v54 = vcombine.low %v4985_v15, %v1552_v16 }
 0x21b   : > { %v2230_v51 = vrot.slane %v3717_v20, %v4338_v35  ;;  %v1559_v57 = vcombine.high %v4834_v8, %v4834_v8  ;;  %v1679_v0 = vrot.slane %v1677_v48, 2  ;;  %v1997_v3 = vrot.slane %v1983_v31, %v4338_v35 }
 0x21c   : > { %v5085_v4 = vcombine.low %v2332_v5, %v2339_v6  ;;  %v2083_v34 = vcombine.low %v2075_v33, %v2082_v36  ;;  %v1990_v27 = vrot.slane %v1982_v46, %v4338_v35  ;;  %v5748_v12 = vrot.slane %v4862_v52, 7 }
 0x21d   : > { %v5749_v63 = vrot.slane %v4838_v19, 9  ;;  %v1680_v43 = vrot.slane %v1559_v57, 7  ;;  %v5750_v17 = vrot.slane %v4858_v56, 7  ;;  %v5751_v48 = vrot.slane %v4883_v10, 7 }
 0x21e   : > { %v5752_v9 = vrot.slane %v4891_v28, 7  ;;  %v5753_v19 = vrot.slane %v4870_v40, 9  ;;  %v3848_v6 = vpack.i.bf16 %v2083_v34, %v2066_v11  ;;  %v1998_v14 = vcombine.low %v1990_v27, %v1997_v3 }
 0x21f   : > { %v1685_v16 = vsel %vm4418_vm6, %v5749_v63, %v5748_v12  ;;  %v1688_v8 = vsel %vm4418_vm6, %v4911_v42, %v5750_v17  ;;  %v1691_v20 = vsel %vm4418_vm6, %v4917_v45, %v5751_v48  ;;  %v2237_v41 = vrot.slane %v2223_v54, %v4338_v35  ;;  %v5761_v63 = vld [vmem:[#allocation31_spill] sm:$0xff] }
 0x220   : > { %v1705_v38 = vsel %vm4418_vm6, %v5753_v19, %v5752_v9  ;;  %v2085_v13 = vcombine.low %v1688_v8, %v1691_v20  ;;  %v3853_v42 = vpack.i.bf16 %v5072_v59, %v5085_v4  ;;  %v1681_v10 = vsel %vm4418_vm6, %v1679_v0, %v1680_v43  ;;  %3849 = vrot.lane.b32.xlu1 %v3848_v6, %s4204_s29  ;;  %v5762_v17 = vld [vmem:[#allocation27_spill] sm:$0xff] }
 0x221   : > { %v5754_v45 = vsel %vm4418_vm6, %v4758_v58, %v4760_v25  ;;  %v1563_v28 = vcombine.high %v4930_v29, %v4930_v29  ;;  %v3858_v33 = vpack.i.bf16 %v4701_v53, %v1998_v14  ;;  %v2084_v26 = vcombine.low %v1681_v10, %v1685_v16 }
 0x222   : > { %v2102_v40 = vcombine.low %v5754_v45, %v1705_v38  ;;  %v2099_v1 = vrot.slane %v2085_v13, %v4338_v35  ;;  %v5755_v5 = vrot.slane %v4887_v7, 7  ;;  %v5756_v58 = vrot.slane %v4903_v32, 7  ;;  %v5765_v13 = vld [vmem:[#allocation18_spill] sm:$0xff] }
 0x223   : > { %v1717_v46 = vrot.slane %v4930_v29, 7  ;;  %v1720_v53 = vrot.slane %v1563_v28, 7  ;;  %3859 = vrot.lane.b32.xlu0 %v3858_v33, %s4204_s29  ;;  %v5142_v11 = vcombine.low %v2230_v51, %v2237_v41  ;;  %v2092_v36 = vrot.slane %v2084_v26, %v4338_v35  ;;  %v5768_v28 = vld [vmem:[#allocation5_spill] sm:$0xff]  ;;  %v5769_v33 = vld [vmem:[#allocation7_spill] sm:$0xff] }
 0x224   : > { %v1708_v55 = vsel %vm4418_vm6, %v4927_v18, %v5755_v5  ;;  %v2116_v44 = vrot.slane %v2102_v40, %v4338_v35  ;;  %v1711_v25 = vsel %vm4418_vm6, %v4936_v47, %v5756_v58  ;;  %v5757_v31 = vrot.slane %v4947_v24, 7  ;;  %3854 = vrot.lane.b32.xlu1 %v3853_v42, %s4202_s27  ;;  %v5766_v42 = vld [vmem:[#allocation16_spill] sm:$0xff] }
 0x225   : > { %v5758_v54 = vrot.slane %v4964_v50, 7  ;;  %v1718_v57 = vsel %vm4418_vm6, %v4995_v61, %v1717_v46  ;;  %v1719_v51 = vrot.slane %v1717_v46, 2  ;;  %v5759_v0 = vrot.slane %v4955_v62, 7 }
 0x226   : > { %v1728_v18 = vsel %vm4418_vm6, %v4999_v2, %v5757_v31  ;;  %v5760_v34 = vrot.slane %v4943_v37, 9  ;;  %v2118_v3 = vcombine.low %v1708_v55, %v1711_v25  ;;  %v2100_v2 = vcombine.low %v2092_v36, %v2099_v1  ;;  %v5776_v36 = vld [vmem:[#allocation8_spill] sm:$0xff] }
 0x227   : > { %v1731_v47 = vsel %vm4418_vm6, %v5010_v39, %v5758_v54  ;;  %v2117_v12 = vcombine.low %v4809_v49, %v2116_v44  ;;  %v2119_v39 = vcombine.low %v5761_v63, %v1718_v57  ;;  %v1721_v61 = vsel %vm4418_vm6, %v1719_v51, %v1720_v53  ;;  %v5775_v53 = vld [vmem:[#allocation26_spill] sm:$0xff]  ;;  %v5780_v63 = vld [vmem:[#allocation23_spill] sm:$0xff] }
 0x228   : > { %v1725_v27 = vsel %vm4418_vm6, %v5760_v34, %v5759_v0  ;;  %v2136_v16 = vcombine.low %v1728_v18, %v1731_v47  ;;  %v2126_v43 = vrot.slane %v2118_v3, %v4338_v35  ;;  %v2359_v8 = vcombine.low %v5762_v17, %v4930_v29 }
 0x229   : > { %v2376_v48 = vcombine.low %v4947_v24, %v4964_v50  ;;  %v3868_v20 = vpack.i.bf16 %v2117_v12, %v2100_v2  ;;  %v2133_v9 = vrot.slane %v2119_v39, %v4338_v35  ;;  %v2135_v19 = vcombine.low %v1721_v61, %v1725_v27  ;;  %v5779_v12 = vld [vmem:[#allocation22_spill] sm:$0xff]  ;;  %v5782_v61 = vld [vmem:[#allocation12_spill] sm:$0xff] }
 0x22a   : > { %v2150_v49 = vrot.slane %v2136_v16, %v4338_v35  ;;  %v5763_v38 = vcombine.low %v4930_v29, %v4943_v37  ;;  %v5764_v6 = vcombine.low %v4488_v60, %v4950_v23  ;;  %v2358_v50 = vcombine.low %v4887_v7, %v4903_v32  ;;  %v5770_v23 = vld [vmem:[#allocation20_spill] sm:$0xff]  ;;  %v5771_v7 = vld [vmem:[#allocation30_spill] sm:$0xff] }
 0x22b   : > { %v2390_v41 = vrot.slane %v2376_v48, %v4338_v35  ;;  %v5767_v10 = vpack.i.bf16 %v5765_v13, %v5766_v42  ;;  %3869 = vrot.lane.b32.xlu0 %v3868_v20, %s4204_s29  ;;  %v2134_v45 = vcombine.low %v2126_v43, %v2133_v9  ;;  %v2143_v40 = vrot.slane %v2135_v19, %v4338_v35  ;;  %v5783_v43 = vld [vmem:[#allocation13_spill] sm:$0xff] }
 0x22c   : > { %v5180_v21 = vrot.slane %v5763_v38, %v4338_v35  ;;  %v5186_v14 = vrot.slane %v5764_v6, %v4338_v35  ;;  %v1850_v60 = vcombine.low %v5769_v33, %v5768_v28  ;;  %v3883_v26 = vpack.i.bf16 %v5770_v23, %v5142_v11 }
 0x22d   : > { %3864 = vrot.lane.b32.xlu1 %v5767_v10, %s4202_s27  ;;  %v2373_v32 = vrot.slane %v2359_v8, %v4338_v35  ;;  %v5772_v1 = vcombine.low %v5771_v7, %v4985_v15  ;;  %v5773_v55 = vcombine.low %v4862_v52, %v4858_v56  ;;  %v2151_v58 = vcombine.low %v2143_v40, %v2150_v49  ;;  %v5778_v56 = vld [vmem:[#allocation25_spill] sm:$0xff]  ;;  %v5786_v40 = vld [vmem:[#allocation24_spill] sm:$0xff] }
 0x22e   : > { %v5774_v25 = vcombine.high %v4930_v29, %v4943_v37  ;;  %v1901_v31 = vcombine.low %v5776_v36, %v5775_v53  ;;  %v5777_v15 = vcombine.low %v4955_v62, %v4947_v24  ;;  %v2366_v29 = vrot.slane %v2358_v50, %v4338_v35 }
 0x22f   : > { %v5206_v5 = vrot.slane %v5772_v1, %v4338_v35  ;;  %v5212_v44 = vrot.slane %v5773_v55, %v4338_v35  ;;  %v3873_v47 = vpack.i.bf16 %v2151_v58, %v2134_v45  ;;  %v5781_v39 = vcombine.low %v5779_v12, %v5780_v63  ;;  %v5785_v45 = vld [vmem:[#allocation6_spill] sm:$0xff]  ;;  %v5794_v63 = vld [vmem:[#allocation21_spill] sm:$0xff] }
 0x230   : > { %v2383_v46 = vrot.slane %v5774_v25, %v4338_v35  ;;  %v5224_v18 = vrot.slane %v5777_v15, %v4338_v35  ;;  %v5237_v62 = vcombine.low %v2366_v29, %v2373_v32  ;;  %v5784_v17 = vcombine.low %v5782_v61, %v5783_v43  ;;  %v5788_v25 = vld [vmem:[#allocation19_spill] sm:$0xff] }
 0x231   : > { %v1782_v52 = vcombine.low %v5186_v14, %v5206_v5  ;;  %v1884_v54 = vcombine.low %v5778_v56, %v5212_v44  ;;  %3884 = vrot.lane.b32.xlu1 %v3883_v26, %s4202_s27  ;;  %3874 = vrot.lane.b32.xlu0 %v3873_v47, %s4204_s29  ;;  %v5787_v28 = vcombine.low %v5785_v45, %v5786_v40 }
 0x232   : > { %v5232_v37 = vcombine.low %v2383_v46, %v2390_v41  ;;  %v1935_v57 = vcombine.low %v5180_v21, %v5224_v18  ;;  %v5789_v46 = vld [vmem:[#allocation11_spill] sm:$0xff]  ;;  %v3724_v21 = vld [vmem:[%s5636_s4] ss:$0 sm:$0xff] }
 0x233   : > { %v5790_v53 = vcombine.low %v5788_v25, %v5789_v46 }
 0x234   : > { %v3878_v24 = vpack.i.bf16 %v5232_v37, %v5237_v62 }
 0x236   : > { %3879 = vrot.lane.b32.xlu0 %v3878_v24, %s4202_s27 }
 0x247   : > { %v3835_v19 = vpop.permute.xlu1 %3834 }
 0x248   : > { %v3830_v51 = vpop.permute.xlu0 %3829  ;;  %v3837_v32 = vunpack.i.h.bf16 %v3835_v19  ;;  %v3836_v44 = vunpack.i.l.bf16 %v3835_v19 }
 0x249   : > { %v3832_v3 = vunpack.i.h.bf16 %v3830_v51  ;;  %v3831_v2 = vunpack.i.l.bf16 %v3830_v51 }
 0x24a   : > { %v2430_v36 = vsel %vm2428_vm8, %v5790_v53, %v3837_v32  ;;  %v5797_v32 = vld [vmem:[#allocation28_spill] sm:$0xff] }
 0x251   : > { %v3840_v0 = vpop.permute.xlu0 %3839 }
 0x252   : > { %v3842_v34 = vunpack.i.h.bf16 %v3840_v0  ;;  %v3841_v27 = vunpack.i.l.bf16 %v3840_v0  ;;  %v5791_v0 = vld [vmem:[#allocation9_spill] sm:$0xff] }
 0x254   : > { %v2434_v16 = vsel %vm2428_vm8, %v5781_v39, %v3842_v34  ;;  %v2433_v8 = vsel %vm2428_vm8, %v5784_v17, %v3841_v27  ;;  %v5792_v34 = vld [vmem:[#allocation10_spill] sm:$0xff]  ;;  %v5795_v39 = vld [vmem:[#allocation17_spill] sm:$0xff] }
 0x255   : > { %v2446_v48 = vsel %vm2441_vm7, %v2433_v8, %v3831_v2  ;;  %v2447_v20 = vsel %vm2441_vm7, %v2434_v16, %v3832_v3  ;;  %v5793_v27 = vcombine.low %v5791_v0, %v5792_v34  ;;  %v5796_v16 = vcombine.low %v5794_v63, %v5795_v39 }
 0x256   : > { %v2456_v9 = vpack.c.bf16 %v2447_v20, %v2446_v48 }
 0x257   : > { %v2429_v3 = vsel %vm2428_vm8, %v5793_v27, %v3836_v44 }
 0x258   : > { %3783 = vmatprep.mubr.msk.bf16.mxu1 %vm2515_vm9, %v2456_v9 }
 0x28b   : > { %v3845_v49 = vpop.permute.xlu1 %3844 }
 0x28c   : > { %v3847_v50 = vunpack.i.h.bf16 %v3845_v49  ;;  %v3846_v41 = vunpack.i.l.bf16 %v3845_v49 }
 0x292   : > { %v3850_v38 = vpop.permute.xlu1 %3849 }
 0x293   : > { %v3852_v6 = vunpack.i.h.bf16 %v3850_v38  ;;  %v3851_v14 = vunpack.i.l.bf16 %v3850_v38 }
 0x295   : > { %v3860_v10 = vpop.permute.xlu0 %3859  ;;  %v2436_v33 = vsel %vm2428_vm8, %v5787_v28, %v3852_v6  ;;  %v2435_v26 = vsel %vm2428_vm8, %v1850_v60, %v3851_v14 }
 0x296   : > { %v2448_v7 = vsel %vm2441_vm7, %v2435_v26, %v3846_v41  ;;  %v2449_v1 = vsel %vm2441_vm7, %v2436_v33, %v3847_v50  ;;  %v3855_v5 = vpop.permute.xlu1 %3854  ;;  %v3862_v58 = vunpack.i.h.bf16 %v3860_v10  ;;  %v3861_v56 = vunpack.i.l.bf16 %v3860_v10 }
 0x297   : > { %v2457_v55 = vpack.c.bf16 %v2449_v1, %v2448_v7  ;;  %v3857_v2 = vunpack.i.h.bf16 %v3855_v5  ;;  %v3856_v12 = vunpack.i.l.bf16 %v3855_v5  ;;  %v5798_v7 = vld [vmem:[#allocation29_spill] sm:$0xff] }
 0x298   : > { %v2432_v61 = vsel %vm2428_vm8, %v5796_v16, %v3862_v58  ;;  %v2431_v9 = vsel %vm2428_vm8, %v1782_v52, %v3861_v56  ;;  %v5799_v1 = vcombine.low %v5797_v32, %v5798_v7 }
 0x299   : > { %3784 = vmatmul.mubr.msk.bf16.vlgmr.msra.gmra.mrb[8].mxu1 %vm2515_vm9, %v2457_v55 }
 0x29d   : > { %v3870_v47 = vpop.permute.xlu0 %3869 }
 0x29e   : > { %v3872_v24 = vunpack.i.h.bf16 %v3870_v47  ;;  %v3871_v51 = vunpack.i.l.bf16 %v3870_v47 }
 0x29f   : > { %v3865_v15 = vpop.permute.xlu1 %3864 }
 0x2a0   : > { %v3867_v60 = vunpack.i.h.bf16 %v3865_v15  ;;  %v3866_v29 = vunpack.i.l.bf16 %v3865_v15  ;;  %v2438_v8 = vsel %vm2428_vm8, %v1901_v31, %v3872_v24  ;;  %v2437_v48 = vsel %vm2428_vm8, %v1884_v54, %v3871_v51 }
 0x2a1   : > { %v2450_v49 = vsel %vm2441_vm7, %v2437_v48, %v3856_v12  ;;  %v2451_v38 = vsel %vm2441_vm7, %v2438_v8, %v3857_v2 }
 0x2a2   : > { %v2442_v43 = vsel %vm2441_vm7, %v2429_v3, %v3866_v29  ;;  %v2443_v17 = vsel %vm2441_vm7, %v2430_v36, %v3867_v60  ;;  %v2458_v50 = vpack.c.bf16 %v2451_v38, %v2450_v49 }
 0x2a3   : > { %v2454_v20 = vpack.c.bf16 %v2443_v17, %v2442_v43  ;;  %v3885_v19 = vpop.permute.xlu1 %3884  ;;  %v3875_v41 = vpop.permute.xlu0 %3874 }
 0x2a4   : > { %v3887_v6 = vunpack.i.h.bf16 %v3885_v19  ;;  %v3886_v14 = vunpack.i.l.bf16 %v3885_v19  ;;  %3787 = vmatprep.mubr.msk.bf16.mxu1 %vm2515_vm9, %v2458_v50  ;;  %v3877_v45 = vunpack.i.h.bf16 %v3875_v41  ;;  %v3876_v52 = vunpack.i.l.bf16 %v3875_v41 }
 0x2a5   : > { %3779 = vmatprep.mubr.msk.bf16.mxu0 %vm2515_vm9, %v2454_v20 }
 0x2a6   : > { %v2445_v10 = vsel %vm2441_vm7, %v2432_v61, %v3887_v6  ;;  %v2444_v31 = vsel %vm2441_vm7, %v2431_v9, %v3886_v14  ;;  %v2440_v26 = vsel %vm2428_vm8, %v1935_v57, %v3877_v45  ;;  %v2439_v5 = vsel %vm2428_vm8, %v5799_v1, %v3876_v52 }
 0x2a7   : > { %v2455_v54 = vpack.c.bf16 %v2445_v10, %v2444_v31 }
 0x2a8   : > { %v3880_v40 = vpop.permute.xlu0 %3879 }
 0x2a9   : > { %3780 = vmatmul.mubr.msk.bf16.vlgmr.msra.gmra.mrb[8].mxu0 %vm2515_vm9, %v2455_v54  ;;  %v3882_v28 = vunpack.i.h.bf16 %v3880_v40  ;;  %v3881_v33 = vunpack.i.l.bf16 %v3880_v40 }
 0x2ab   : > { %v2452_v55 = vsel %vm2441_vm7, %v2439_v5, %v3881_v33  ;;  %v2453_v44 = vsel %vm2441_vm7, %v2440_v26, %v3882_v28 }
 0x2ac   : > { %v2459_v58 = vpack.c.bf16 %v2453_v44, %v2452_v55 }
 0x2ae   : > { %3788 = vmatmul.mubr.msk.bf16.gmra.mrb[12].mxu1 %vm2515_vm9, %v2459_v58 }
 0x36c   : > { %v3785_v25 = vpop.f32.mrb[8].mxu1 }
 0x36d   : > { %v2584_v46 = vpop.f32.mrb[9].mxu1  ;;  %v5311_v27 = vadd.f32 %v3785_v25, %v3724_v21 }
 0x36e   : > { %v3786_v53 = vpop.f32.mrb[10].mxu1  ;;  %v5301_v56 = vadd.f32 %v3724_v21, %v2584_v46 }
 0x36f   : > { %v2587_v36 = vpop.f32.mrb[11].mxu1  ;;  %v3743_v43 = vmul.f32 -1.442695, %v5311_v27  ;;  %v5319_v17 = vadd.f32 %v3786_v53, %v3724_v21 }
 0x370   : > { %v3741_v3 = vmul.f32 -1.442695, %v5301_v56  ;;  %v5314_v12 = vadd.f32 %v3724_v21, %v2587_v36 }
 0x371   : > { %v3744_v9 = vmul.f32 -1.442695, %v5319_v17 }
 0x372   : > { %v3742_v48 = vmul.f32 -1.442695, %v5314_v12 }
 0x37c   : > { %v3781_v18 = vpop.f32.mrb[8].mxu0 }
 0x37d   : > { %v5299_v57 = vadd.f32 %v3781_v18, %v3724_v21  ;;  %v2568_v15 = vpop.f32.mrb[9].mxu0 }
 0x37e   : > { %v5303_v47 = vadd.f32 %v3724_v21, %v2568_v15  ;;  %v3782_v60 = vpop.f32.mrb[10].mxu0 }
 0x37f   : > { %v3739_v29 = vmul.f32 -1.442695, %v5299_v57  ;;  %v5306_v24 = vadd.f32 %v3782_v60, %v3724_v21  ;;  %v2571_v51 = vpop.f32.mrb[11].mxu0 }
 0x380   : > { %v3737_v0 = vmul.f32 -1.442695, %v5303_v47  ;;  %v5309_v34 = vadd.f32 %v3724_v21, %v2571_v51 }
 0x381   : > { %4086 = vpow2.f32 %v3739_v29  ;;  %v3789_v2 = vpop.f32.mrb[12].mxu1  ;;  %v3740_v63 = vmul.f32 -1.442695, %v5306_v24 }
 0x382   : > { %4088 = vpow2.f32 %v3737_v0  ;;  %v2600_v39 = vpop.f32.mrb[13].mxu1  ;;  %v3738_v16 = vmul.f32 -1.442695, %v5309_v34  ;;  %v5322_v20 = vadd.f32 %v3789_v2, %v3724_v21 }
 0x383   : > { %v3790_v61 = vpop.f32.mrb[14].mxu1  ;;  %4090 = vpow2.f32 %v3741_v3  ;;  %v5325_v19 = vadd.f32 %v3724_v21, %v2600_v39 }
 0x384   : > { %v2603_v8 = vpop.f32.mrb[15].mxu1  ;;  %4092 = vpow2.f32 %v3740_v63  ;;  %v3747_v38 = vmul.f32 -1.442695, %v5322_v20  ;;  %v5331_v31 = vadd.f32 %v3790_v61, %v3724_v21 }
 0x385   : > { %4094 = vpow2.f32 %v3738_v16  ;;  %v5328_v6 = vadd.f32 %v3724_v21, %v2603_v8  ;;  %v3745_v41 = vmul.f32 -1.442695, %v5325_v19 }
 0x386   : > { %4096 = vpow2.f32 %v3743_v43  ;;  %v3748_v32 = vmul.f32 -1.442695, %v5331_v31 }
 0x387   : > { %4098 = vpow2.f32 %v3742_v48  ;;  %v3746_v54 = vmul.f32 -1.442695, %v5328_v6 }
 0x388   : > { %4100 = vpow2.f32 %v3744_v9  ;;  %v2629_v9 = vadd.f32 %v5299_v57, %v5142_v11 }
 0x38b   : > { %v4087_v49 = vpop.eup %4086 }
 0x38c   : > { %v4089_v14 = vpop.eup %4088  ;;  %v2677_v50 = vadd.f32 1.0, %v4087_v49 }
 0x38d   : > { %v2675_v10 = vadd.f32 1.0, %v4089_v14  ;;  %v4091_v45 = vpop.eup %4090 }
 0x38e   : > { %4102 = vrcp.f32 %v2677_v50  ;;  %v4093_v52 = vpop.eup %4092  ;;  %v2679_v7 = vadd.f32 1.0, %v4091_v45  ;;  %v2627_v50 = vadd.f32 %v5303_v47, %v5766_v42 }
 0x38f   : > { %4104 = vpow2.f32 %v3747_v38  ;;  %v4095_v40 = vpop.eup %4094  ;;  %v2678_v28 = vadd.f32 1.0, %v4093_v52 }
 0x390   : > { %4106 = vpow2.f32 %v3745_v41  ;;  %v4097_v33 = vpop.eup %4096  ;;  %v2676_v26 = vadd.f32 1.0, %v4095_v40  ;;  %v2628_v40 = vadd.f32 %v5309_v34, %v5765_v13 }
 0x391   : > { %4108 = vrcp.f32 %v2675_v10  ;;  %v4099_v1 = vpop.eup %4098  ;;  %v2681_v5 = vadd.f32 1.0, %v4097_v33  ;;  %v2630_v10 = vadd.f32 %v5306_v24, %v5770_v23  ;;  %v2633_v23 = vadd.f32 %v5311_v27, %v5044_v30 }
 0x392   : > { %4110 = vpow2.f32 %v3746_v54  ;;  %v4101_v55 = vpop.eup %4100  ;;  %v2680_v58 = vadd.f32 1.0, %v4099_v1  ;;  %v2634_v1 = vadd.f32 %v5319_v17, %v5046_v22  ;;  %v2637_v17 = vadd.f32 %v5322_v20, %v5237_v62 }
 0x393   : > { %4112 = vrcp.f32 %v2678_v28  ;;  %v2682_v46 = vadd.f32 1.0, %v4101_v55  ;;  %v2638_v20 = vadd.f32 %v5331_v31, %v5232_v37 }
 0x394   : > { %4114 = vrcp.f32 %v2676_v26  ;;  %v5800_v26 = vld [vmem:[#allocation14_spill] sm:$0xff] }
 0x395   : > { %4116 = vpow2.f32 %v3748_v32  ;;  %v2631_v13 = vadd.f32 %v5301_v56, %v5800_v26 }
 0x396   : > { %4118 = vrcp.f32 %v2679_v7 }
 0x397   : > { %4120 = vrcp.f32 %v2681_v5 }
 0x398   : > { %v4103_v44 = vpop.eup %4102  ;;  %4122 = vrcp.f32 %v2680_v58 }
 0x399   : > { %v4105_v25 = vpop.eup %4104  ;;  %2727 = vrot.lane.b32.xlu0 %v4103_v44, %s4203_s28  ;;  %4124 = vrcp.f32 %v2682_v46  ;;  %v5801_v44 = vld [vmem:[#allocation15_spill] sm:$0xff]  ;;  %v2635_v46 = vadd.f32 %v5325_v19, %v5085_v4  ;;  %v2636_v4 = vadd.f32 %v5328_v6, %v5072_v59 }
 0x39a   : > { %v4107_v53 = vpop.eup %4106  ;;  %v2685_v21 = vadd.f32 1.0, %v4105_v25  ;;  %v2632_v58 = vadd.f32 %v5314_v12, %v5801_v44 }
 0x39b   : > { %v4109_v36 = vpop.eup %4108  ;;  %v2683_v60 = vadd.f32 1.0, %v4107_v53 }
 0x39c   : > { %v4111_v18 = vpop.eup %4110  ;;  %4126 = vrcp.f32 %v2685_v21 }
 0x39d   : > { %2723 = vrot.lane.b32.xlu0 %v4109_v36, %s4203_s28  ;;  %v4113_v15 = vpop.eup %4112  ;;  %v2684_v51 = vadd.f32 1.0, %v4111_v18  ;;  %4128 = vrcp.f32 %v2683_v60 }
 0x39e   : > { %2729 = vrot.lane.b32.xlu1 %v4113_v15, %s4203_s28  ;;  %v4115_v29 = vpop.eup %4114 }
 0x39f   : > { %v4117_v0 = vpop.eup %4116  ;;  %4130 = vrcp.f32 %v2684_v51 }
 0x3a0   : > { %v4119_v3 = vpop.eup %4118  ;;  %v2686_v63 = vadd.f32 1.0, %v4117_v0 }
 0x3a1   : > { %2725 = vrot.lane.b32.xlu0 %v4115_v29, %s4203_s28  ;;  %v4121_v2 = vpop.eup %4120 }
 0x3a2   : > { %2731 = vrot.lane.b32.xlu1 %v4119_v3, %s4203_s28  ;;  %v4123_v39 = vpop.eup %4122  ;;  %4132 = vrcp.f32 %v2686_v63 }
 0x3a3   : > { %v4125_v16 = vpop.eup %4124 }
 0x3a5   : > { %2735 = vrot.lane.b32.xlu0 %v4121_v2, %s4203_s28 }
 0x3a6   : > { %2733 = vrot.lane.b32.xlu1 %v4123_v39, %s4203_s28  ;;  %v4127_v61 = vpop.eup %4126 }
 0x3a7   : > { %v4129_v43 = vpop.eup %4128 }
 0x3a9   : > { %2737 = vrot.lane.b32.xlu0 %v4125_v16, %s4203_s28  ;;  %v4131_v8 = vpop.eup %4130 }
 0x3aa   : > { %2743 = vrot.lane.b32.xlu1 %v4127_v61, %s4203_s28 }
 0x3ac   : > { %v4133_v48 = vpop.eup %4132 }
 0x3ad   : > { %2739 = vrot.lane.b32.xlu0 %v4129_v43, %s4203_s28 }
 0x3ae   : > { %2741 = vrot.lane.b32.xlu1 %v4131_v8, %s4203_s28 }
 0x3b2   : > { %2745 = vrot.lane.b32.xlu1 %v4133_v48, %s4203_s28 }
 0x40b   : > { %v2728_v49 = vpop.permute.xlu0 %2727 }
 0x40c   : > { %v2761_v38 = vmul.f32 %v2728_v49, %v2629_v9 }
 0x40e   : > { %v2777_v14 = vsel %vm2428_vm8, %v2761_v38, 0.0 }
 0x40f   : > { %2778 = vadd.xlane.f32.xlu1 %v2777_v14  ;;  %v2724_v41 = vpop.permute.xlu0 %2723 }
 0x410   : > { %v2759_v54 = vmul.f32 %v2724_v41, %v2627_v50  ;;  %v2730_v45 = vpop.permute.xlu1 %2729 }
 0x411   : > { %v2762_v52 = vmul.f32 %v2730_v45, %v2630_v10 }
 0x412   : > { %v2771_v11 = vsel %vm2428_vm8, %v2759_v54, 0.0 }
 0x413   : > { %v2726_v57 = vpop.permute.xlu0 %2725  ;;  %2772 = vadd.xlane.f32.xlu0 %v2771_v11  ;;  %v2780_v28 = vsel %vm2428_vm8, %v2762_v52, 0.0 }
 0x414   : > { %v5358_v33 = vmul.f32 %v2726_v57, %v2628_v40  ;;  %v2732_v42 = vpop.permute.xlu1 %2731  ;;  %2781 = vadd.xlane.f32.xlu1 %v2780_v28 }
 0x415   : > { %v5366_v7 = vmul.f32 %v2732_v42, %v2631_v13 }
 0x416   : > { %v2774_v47 = vsel %vm2428_vm8, %v5358_v33, 0.0 }
 0x417   : > { %v2736_v24 = vpop.permute.xlu0 %2735  ;;  %v2783_v53 = vsel %vm2428_vm8, %v5366_v7, 0.0 }
 0x418   : > { %v2765_v34 = vmul.f32 %v2736_v24, %v2633_v23  ;;  %v2734_v32 = vpop.permute.xlu1 %2733  ;;  %2775 = vadd.xlane.f32.xlu1 %v2774_v47 }
 0x419   : > { %v5373_v25 = vmul.f32 %v2734_v32, %v2632_v58 }
 0x41a   : > { %v2789_v5 = vsel %vm2428_vm8, %v2765_v34, 0.0 }
 0x41b   : > { %v2738_v55 = vpop.permute.xlu0 %2737  ;;  %2790 = vadd.xlane.f32.xlu0 %v2789_v5  ;;  %v2786_v15 = vsel %vm2428_vm8, %v5373_v25, 0.0 }
 0x41c   : > { %v2766_v30 = vmul.f32 %v2738_v55, %v2634_v1  ;;  %v2744_v27 = vpop.permute.xlu1 %2743 }
 0x41d   : > { %v5382_v21 = vmul.f32 %v2744_v27, %v2637_v17 }
 0x41e   : > { %v2792_v56 = vsel %vm2428_vm8, %v2766_v30, 0.0 }
 0x41f   : > { %2793 = vadd.xlane.f32.xlu1 %v2792_v56  ;;  %v2740_v22 = vpop.permute.xlu0 %2739  ;;  %2784 = vadd.xlane.f32.xlu0 %v2783_v53  ;;  %v2801_v60 = vsel %vm2428_vm8, %v5382_v21, 0.0 }
 0x420   : > { %v2767_v36 = vmul.f32 %v2740_v22, %v2635_v46  ;;  %v2742_v12 = vpop.permute.xlu1 %2741 }
 0x421   : > { %v5389_v19 = vmul.f32 %v2742_v12, %v2636_v4 }
 0x422   : > { %v2795_v18 = vsel %vm2428_vm8, %v2767_v36, 0.0 }
 0x423   : > { %2796 = vadd.xlane.f32.xlu1 %v2795_v18  ;;  %2787 = vadd.xlane.f32.xlu0 %v2786_v15  ;;  %v2798_v51 = vsel %vm2428_vm8, %v5389_v19, 0.0 }
 0x424   : > { %v2746_v62 = vpop.permute.xlu1 %2745 }
 0x425   : > { %v5395_v29 = vmul.f32 %v2746_v62, %v2638_v20 }
 0x427   : > { %2802 = vadd.xlane.f32.xlu0 %v2801_v60  ;;  %v2804_v0 = vsel %vm2428_vm8, %v5395_v29, 0.0 }
 0x42b   : > { %2799 = vadd.xlane.f32.xlu0 %v2798_v51 }
 0x42f   : > { %2805 = vadd.xlane.f32.xlu0 %v2804_v0 }
 0x49c   : > { %v2779_v59 = vpop.xlane.xlu1 %2778 }
 0x49d   : > { %v2810_v6 = vmul.f32 0.03125, %v2779_v59 }
 0x49f   : > { %v5401_v3 = vsub.f32 %v2761_v38, %v2810_v6 }
 0x4a0   : > { %v2773_v2 = vpop.xlane.xlu0 %2772 }
 0x4a1   : > { %v2808_v63 = vmul.f32 0.03125, %v2773_v2  ;;  %v2834_v39 = vmul.f32 %v5401_v3, %v5401_v3  ;;  %v2782_v37 = vpop.xlane.xlu1 %2781 }
 0x4a2   : > { %v2811_v31 = vmul.f32 0.03125, %v2782_v37 }
 0x4a3   : > { %v5405_v16 = vsub.f32 %v2759_v54, %v2808_v63  ;;  %v2850_v61 = vsel %vm2428_vm8, %v2834_v39, 0.0 }
 0x4a4   : > { %2851 = vadd.xlane.f32.xlu1 %v2850_v61  ;;  %v5408_v43 = vsub.f32 %v2762_v52, %v2811_v31 }
 0x4a5   : > { %v2832_v8 = vmul.f32 %v5405_v16, %v5405_v16  ;;  %v2776_v48 = vpop.xlane.xlu1 %2775 }
 0x4a6   : > { %v2809_v9 = vmul.f32 0.03125, %v2776_v48  ;;  %v2835_v49 = vmul.f32 %v5408_v43, %v5408_v43 }
 0x4a7   : > { %v2844_v38 = vsel %vm2428_vm8, %v2832_v8, 0.0 }
 0x4a8   : > { %2845 = vadd.xlane.f32.xlu1 %v2844_v38  ;;  %v2791_v14 = vpop.xlane.xlu0 %2790  ;;  %v5416_v50 = vsub.f32 %v5358_v33, %v2809_v9  ;;  %v2853_v41 = vsel %vm2428_vm8, %v2835_v49, 0.0  ;;  %v5470_v49 = vld [vmem:[%s5637_s5] ss:$0 sm:$0xff] }
 0x4a9   : > { %v2814_v10 = vmul.f32 0.03125, %v2791_v14  ;;  %2854 = vadd.xlane.f32.xlu0 %v2853_v41 }
 0x4aa   : > { %v2833_v45 = vmul.f32 %v5416_v50, %v5416_v50 }
 0x4ab   : > { %v5419_v54 = vsub.f32 %v2765_v34, %v2814_v10 }
 0x4ac   : > { %v2794_v52 = vpop.xlane.xlu1 %2793  ;;  %v2785_v40 = vpop.xlane.xlu0 %2784  ;;  %v2847_v57 = vsel %vm2428_vm8, %v2833_v45, 0.0 }
 0x4ad   : > { %v2815_v11 = vmul.f32 0.03125, %v2794_v52  ;;  %v2812_v28 = vmul.f32 0.03125, %v2785_v40  ;;  %v2838_v42 = vmul.f32 %v5419_v54, %v5419_v54  ;;  %2848 = vadd.xlane.f32.xlu1 %v2847_v57  ;;  %v5476_v52 = vld [vmem:[%s5638_s6] ss:$0 sm:$0xff] }
 0x4af   : > { %v5426_v33 = vsub.f32 %v2766_v30, %v2815_v11  ;;  %v5429_v47 = vsub.f32 %v5366_v7, %v2812_v28  ;;  %v2862_v23 = vsel %vm2428_vm8, %v2838_v42, 0.0 }
 0x4b0   : > { %v2797_v24 = vpop.xlane.xlu1 %2796  ;;  %v2788_v26 = vpop.xlane.xlu0 %2787 }
 0x4b1   : > { %v2816_v13 = vmul.f32 0.03125, %v2797_v24  ;;  %v2813_v34 = vmul.f32 0.03125, %v2788_v26  ;;  %v2839_v32 = vmul.f32 %v5426_v33, %v5426_v33  ;;  %v2836_v1 = vmul.f32 %v5429_v47, %v5429_v47  ;;  %2863 = vadd.xlane.f32.xlu1 %v2862_v23 }
 0x4b3   : > { %v5436_v5 = vsub.f32 %v2767_v36, %v2816_v13  ;;  %v5439_v55 = vsub.f32 %v5373_v25, %v2813_v34  ;;  %v2865_v7 = vsel %vm2428_vm8, %v2839_v32, 0.0  ;;  %v2856_v44 = vsel %vm2428_vm8, %v2836_v1, 0.0 }
 0x4b4   : > { %2857 = vadd.xlane.f32.xlu0 %v2856_v44  ;;  %v2803_v58 = vpop.xlane.xlu0 %2802 }
 0x4b5   : > { %v2818_v30 = vmul.f32 0.03125, %v2803_v58  ;;  %v2840_v27 = vmul.f32 %v5436_v5, %v5436_v5  ;;  %v2837_v56 = vmul.f32 %v5439_v55, %v5439_v55  ;;  %2866 = vadd.xlane.f32.xlu1 %v2865_v7 }
 0x4b7   : > { %v5448_v46 = vsub.f32 %v5382_v21, %v2818_v30  ;;  %v2868_v25 = vsel %vm2428_vm8, %v2840_v27, 0.0  ;;  %v2859_v53 = vsel %vm2428_vm8, %v2837_v56, 0.0 }
 0x4b8   : > { %2860 = vadd.xlane.f32.xlu0 %v2859_v53  ;;  %v2800_v22 = vpop.xlane.xlu0 %2799 }
 0x4b9   : > { %v2817_v17 = vmul.f32 0.03125, %v2800_v22  ;;  %v2842_v36 = vmul.f32 %v5448_v46, %v5448_v46  ;;  %2869 = vadd.xlane.f32.xlu1 %v2868_v25 }
 0x4bb   : > { %v5455_v12 = vsub.f32 %v5389_v19, %v2817_v17  ;;  %v2874_v18 = vsel %vm2428_vm8, %v2842_v36, 0.0 }
 0x4bc   : > { %2875 = vadd.xlane.f32.xlu0 %v2874_v18  ;;  %v2806_v15 = vpop.xlane.xlu0 %2805 }
 0x4bd   : > { %v2819_v21 = vmul.f32 0.03125, %v2806_v15  ;;  %v2841_v4 = vmul.f32 %v5455_v12, %v5455_v12 }
 0x4bf   : > { %v5461_v60 = vsub.f32 %v5395_v29, %v2819_v21  ;;  %v2871_v62 = vsel %vm2428_vm8, %v2841_v4, 0.0 }
 0x4c0   : > { %2872 = vadd.xlane.f32.xlu0 %v2871_v62 }
 0x4c1   : > { %v2843_v20 = vmul.f32 %v5461_v60, %v5461_v60 }
 0x4c3   : > { %v2877_v19 = vsel %vm2428_vm8, %v2843_v20, 0.0 }
 0x4c4   : > { %2878 = vadd.xlane.f32.xlu0 %v2877_v19 }
 0x531   : > { %v2852_v51 = vpop.xlane.xlu1 %2851 }
 0x532   : > { %v2882_v0 = vmul.f32 0.03125, %v2852_v51 }
 0x534   : > { %v2894_v59 = vadd.f32 1e-12, %v2882_v0 }
 0x535   : > { %v2846_v6 = vpop.xlane.xlu1 %2845 }
 0x536   : > { %4134 = vrsqrt.f32 %v2894_v59  ;;  %v2880_v2 = vmul.f32 0.03125, %v2846_v6  ;;  %v2855_v63 = vpop.xlane.xlu0 %2854 }
 0x537   : > { %v2883_v37 = vmul.f32 0.03125, %v2855_v63 }
 0x538   : > { %v2892_v39 = vadd.f32 1e-12, %v2880_v2 }
 0x539   : > { %v2895_v29 = vadd.f32 1e-12, %v2883_v37 }
 0x53a   : > { %4136 = vrsqrt.f32 %v2892_v39  ;;  %v2849_v31 = vpop.xlane.xlu1 %2848 }
 0x53b   : > { %4138 = vrsqrt.f32 %v2895_v29  ;;  %v2881_v61 = vmul.f32 0.03125, %v2849_v31 }
 0x53d   : > { %v2893_v8 = vadd.f32 1e-12, %v2881_v61 }
 0x53e   : > { %v2864_v48 = vpop.xlane.xlu1 %2863 }
 0x53f   : > { %4140 = vrsqrt.f32 %v2893_v8  ;;  %v2886_v38 = vmul.f32 0.03125, %v2864_v48 }
 0x540   : > { %v4135_v9 = vpop.eup %4134 }
 0x541   : > { %v2918_v14 = vmul.f32 %v4135_v9, %v5401_v3  ;;  %v2858_v41 = vpop.xlane.xlu0 %2857  ;;  %v2898_v10 = vadd.f32 1e-12, %v2886_v38 }
 0x542   : > { %v2884_v45 = vmul.f32 0.03125, %v2858_v41  ;;  %v2867_v11 = vpop.xlane.xlu1 %2866 }
 0x543   : > { %v2937_v40 = vmul.f32 %v5470_v49, %v2918_v14  ;;  %4142 = vrsqrt.f32 %v2898_v10  ;;  %v2887_v28 = vmul.f32 0.03125, %v2867_v11 }
 0x544   : > { %v4137_v57 = vpop.eup %4136  ;;  %v2896_v42 = vadd.f32 1e-12, %v2884_v45 }
 0x545   : > { %v2916_v23 = vmul.f32 %v4137_v57, %v5405_v16  ;;  %v2861_v24 = vpop.xlane.xlu0 %2860  ;;  %v2956_v3 = vadd.f32 %v5476_v52, %v2937_v40  ;;  %v4139_v26 = vpop.eup %4138  ;;  %v2899_v13 = vadd.f32 1e-12, %v2887_v28 }
 0x546   : > { %4144 = vrsqrt.f32 %v2896_v42  ;;  %v2885_v34 = vmul.f32 0.03125, %v2861_v24  ;;  %v2919_v1 = vmul.f32 %v4139_v26, %v5408_v43  ;;  %v2870_v7 = vpop.xlane.xlu1 %2869 }
 0x547   : > { %v2935_v32 = vmul.f32 %v5470_v49, %v2916_v23  ;;  %v3012_v44 = vcombine.high %v2956_v3, %v2956_v3  ;;  %v5484_v58 = vrot.slane %v2956_v3, %v4338_v35  ;;  %4146 = vrsqrt.f32 %v2899_v13 }
 0x548   : > { %v2888_v30 = vmul.f32 0.03125, %v2870_v7  ;;  %v2897_v27 = vadd.f32 1e-12, %v2885_v34  ;;  %v2938_v16 = vmul.f32 %v5470_v49, %v2919_v1 }
 0x549   : > { %v2876_v56 = vpop.xlane.xlu0 %2875  ;;  %v3026_v25 = vrot.slane %v3012_v44, %v4338_v35  ;;  %v3027_v53 = vcombine.high %v5484_v58, %v5484_v58  ;;  %v2954_v22 = vadd.f32 %v5476_v52, %v2935_v32  ;;  %v4141_v17 = vpop.eup %4140  ;;  %v3232_v18 = vrot.slane %v5484_v58, %v4338_v35 }
 0x54a   : > { %v2900_v43 = vadd.f32 1e-12, %v2888_v30  ;;  %4148 = vrsqrt.f32 %v2897_v27  ;;  %v2890_v36 = vmul.f32 0.03125, %v2876_v56  ;;  %v2917_v15 = vmul.f32 %v4141_v17, %v5416_v50 }
 0x54b   : > { %v3028_v21 = vcombine.high %v3026_v25, %v3026_v25  ;;  %v3237_v4 = vcombine.low %v3027_v53, %v3026_v25  ;;  %v2978_v62 = vcombine.high %v2954_v22, %v2954_v22  ;;  %v5495_v19 = vadd.f32 %v5476_v52, %v2938_v16 }
 0x54c   : > { %4150 = vrsqrt.f32 %v2900_v43  ;;  %v2902_v20 = vadd.f32 1e-12, %v2890_v36  ;;  %v2985_v51 = vrot.slane %v2954_v22, %v4338_v35  ;;  %v2936_v2 = vmul.f32 %v5470_v49, %v2917_v15 }
 0x54d   : > { %v2873_v0 = vpop.xlane.xlu0 %2872  ;;  %v3244_v59 = vrot.slane %v3237_v4, %v4338_v35  ;;  %v3251_v6 = vrot.slane %v3028_v21, %v4338_v35  ;;  %v2992_v63 = vrot.slane %v2978_v62, %v4338_v35  ;;  %v4143_v50 = vpop.eup %4142  ;;  %v3029_v37 = vcombine.high %v5495_v19, %v5495_v19 }
 0x54e   : > { %4152 = vrsqrt.f32 %v2902_v20  ;;  %v2889_v39 = vmul.f32 0.03125, %v2873_v0  ;;  %v2993_v29 = vcombine.high %v2985_v51, %v2985_v51  ;;  %v2922_v31 = vmul.f32 %v4143_v50, %v5419_v54 }
 0x54f   : > { %v3252_v61 = vcombine.low %v3244_v59, %v3251_v6  ;;  %v2955_v8 = vadd.f32 %v5476_v52, %v2936_v2  ;;  %v2994_v48 = vcombine.high %v2992_v63, %v2992_v63  ;;  %v5507_v14 = vrot.slane %v3029_v37, %v4338_v35 }
 0x550   : > { %v4145_v9 = vpop.eup %4144  ;;  %v2901_v38 = vadd.f32 1e-12, %v2889_v39  ;;  %v3182_v41 = vcombine.low %v2985_v51, %v2993_v29  ;;  %v3196_v10 = vrot.slane %v2992_v63, %v4338_v35  ;;  %v2941_v45 = vmul.f32 %v5470_v49, %v2922_v31 }
 0x551   : > { %v2920_v40 = vmul.f32 %v4145_v9, %v5429_v47  ;;  %3253 = vrot.lane.b32.xlu0 %v3252_v61, %s4203_s28  ;;  %v2879_v11 = vpop.xlane.xlu0 %2878  ;;  %v3002_v54 = vrot.slane %v2955_v8, %v4338_v35  ;;  %v2995_v57 = vcombine.high %v2955_v8, %v2955_v8  ;;  %v4147_v28 = vpop.eup %4146  ;;  %v3045_v23 = vcombine.high %v5507_v14, %v5507_v14 }
 0x552   : > { %4154 = vrsqrt.f32 %v2901_v38  ;;  %v2891_v42 = vmul.f32 0.03125, %v2879_v11  ;;  %v3189_v24 = vrot.slane %v3182_v41, %v4338_v35  ;;  %v2923_v3 = vmul.f32 %v4147_v28, %v5426_v33 }
 0x553   : > { %v3010_v26 = vcombine.high %v3002_v54, %v3002_v54  ;;  %v3199_v13 = vcombine.low %v2994_v48, %v3002_v54  ;;  %v3009_v47 = vrot.slane %v2995_v57, %v4338_v35  ;;  %v5520_v1 = vadd.f32 %v5476_v52, %v2941_v45 }
 0x554   : > { %v4149_v34 = vpop.eup %4148  ;;  %v2903_v32 = vadd.f32 1e-12, %v2891_v42  ;;  %v2939_v7 = vmul.f32 %v5470_v49, %v2920_v40  ;;  %v5523_v44 = vcombine.low %v3189_v24, %v3196_v10  ;;  %v2942_v25 = vmul.f32 %v5470_v49, %v2923_v3 }
 0x555   : > { %v2921_v30 = vmul.f32 %v4149_v34, %v5439_v55  ;;  %v3206_v27 = vrot.slane %v3199_v13, %v4338_v35  ;;  %v3213_v16 = vrot.slane %v3010_v26, %v4338_v35  ;;  %v3011_v33 = vcombine.high %v3009_v47, %v3009_v47 }
 0x556   : > { %v4151_v56 = vpop.eup %4150  ;;  %4156 = vrsqrt.f32 %v2903_v32  ;;  %v3080_v53 = vcombine.high %v5520_v1, %v5520_v1  ;;  %v2958_v22 = vadd.f32 %v5476_v52, %v2939_v7  ;;  %v2961_v21 = vadd.f32 %v5476_v52, %v2942_v25 }
 0x557   : > { %v2924_v17 = vmul.f32 %v4151_v56, %v5436_v5  ;;  %v3214_v43 = vcombine.low %v3206_v27, %v3213_v16  ;;  %v3218_v36 = vcombine.low %v3009_v47, %v3011_v33  ;;  %v2940_v55 = vmul.f32 %v5470_v49, %v2921_v30 }
 0x558   : > { %v4153_v15 = vpop.eup %4152  ;;  %v5536_v4 = vrot.slane %v3080_v53, %v4338_v35  ;;  %v3053_v62 = vrot.slane %v2958_v22, %v4338_v35  ;;  %v3046_v20 = vcombine.high %v2958_v22, %v2958_v22  ;;  %v3104_v2 = vrot.slane %v2961_v21, %v4338_v35 }
 0x559   : > { %v2926_v51 = vmul.f32 %v4153_v15, %v5448_v46  ;;  %3215 = vrot.lane.b32.xlu1 %v3214_v43, %s4204_s29  ;;  %v3225_v0 = vrot.slane %v3218_v36, %v4338_v35  ;;  %v2943_v5 = vmul.f32 %v5470_v49, %v2924_v17  ;;  %v2959_v59 = vadd.f32 %v5476_v52, %v2940_v55 }
 0x55a   : > { %v3096_v6 = vcombine.high %v5536_v4, %v5536_v4  ;;  %v3061_v63 = vcombine.high %v3053_v62, %v3053_v62  ;;  %v3273_v50 = vcombine.low %v3045_v23, %v3053_v62  ;;  %v3097_v29 = vcombine.high %v2961_v21, %v2961_v21 }
 0x55b   : > { %v2945_v39 = vmul.f32 %v5470_v49, %v2926_v51  ;;  %v3233_v46 = vcombine.low %v3225_v0, %v3232_v18  ;;  %v2962_v37 = vadd.f32 %v5476_v52, %v2943_v5  ;;  %v3112_v61 = vcombine.high %v3104_v2, %v3104_v2 }
 0x55c   : > { %v4155_v31 = vpop.eup %4154  ;;  %v3347_v8 = vcombine.low %v3096_v6, %v3104_v2  ;;  %v3280_v48 = vrot.slane %v3273_v50, %v4338_v35  ;;  %v3287_v9 = vrot.slane %v3061_v63, %v4338_v35  ;;  %v3111_v41 = vrot.slane %v3097_v29, %v4338_v35 }
 0x55d   : > { %v2925_v38 = vmul.f32 %v4155_v31, %v5455_v12  ;;  %3234 = vrot.lane.b32.xlu0 %v3233_v46, %s4202_s27  ;;  %v3121_v10 = vrot.slane %v2962_v37, %v4338_v35  ;;  %v3060_v58 = vrot.slane %v3046_v20, %v4338_v35  ;;  %v3361_v45 = vrot.slane %v3112_v61, %v4338_v35 }
 0x55e   : > { %v3354_v18 = vrot.slane %v3347_v8, %v4338_v35  ;;  %v3288_v40 = vcombine.low %v3280_v48, %v3287_v9  ;;  %v3070_v11 = vrot.slane %v2959_v59, %v4338_v35  ;;  %v3113_v57 = vcombine.high %v3111_v41, %v3111_v41 }
 0x55f   : > { %v2944_v54 = vmul.f32 %v5470_v49, %v2925_v38  ;;  %v3380_v12 = vrot.slane %v3121_v10, %v4338_v35  ;;  %v3062_v28 = vcombine.high %v3060_v58, %v3060_v58  ;;  %v3114_v3 = vcombine.high %v2962_v37, %v2962_v37 }
 0x560   : > { %v4157_v42 = vpop.eup %4156  ;;  %v3362_v23 = vcombine.low %v3354_v18, %v3361_v45  ;;  %v3306_v24 = vrot.slane %v3070_v11, %v4338_v35  ;;  %v3129_v26 = vcombine.high %v3121_v10, %v3121_v10  ;;  %v3366_v47 = vcombine.low %v3111_v41, %v3113_v57 }
 0x561   : > { %v2927_v13 = vmul.f32 %v4157_v42, %v5461_v60  ;;  %3289 = vrot.lane.b32.xlu0 %v3288_v40, %s4204_s29  ;;  %v3292_v34 = vcombine.low %v3060_v58, %v3062_v28  ;;  %v3063_v32 = vcombine.high %v2959_v59, %v2959_v59  ;;  %v3128_v7 = vrot.slane %v3114_v3, %v4338_v35 }
 0x562   : > { %3363 = vrot.lane.b32.xlu1 %v3362_v23, %s4204_s29  ;;  %v3078_v30 = vcombine.high %v3070_v11, %v3070_v11  ;;  %v2964_v27 = vadd.f32 %v5476_v52, %v2945_v39  ;;  %v2963_v16 = vadd.f32 %v5476_v52, %v2944_v54  ;;  %v3373_v33 = vrot.slane %v3366_v47, %v4338_v35 }
 0x563   : > { %v3299_v56 = vrot.slane %v3292_v34, %v4338_v35  ;;  %v3077_v60 = vrot.slane %v3063_v32, %v4338_v35  ;;  %v2946_v25 = vmul.f32 %v5470_v49, %v2927_v13  ;;  %v3130_v53 = vcombine.high %v3128_v7, %v3128_v7 }
 0x564   : > { %v3385_v22 = vcombine.low %v3129_v26, %v3128_v7  ;;  %v3148_v17 = vcombine.high %v2964_v27, %v2964_v27  ;;  %v3131_v43 = vcombine.high %v2963_v16, %v2963_v16  ;;  %v3381_v36 = vcombine.low %v3373_v33, %v3380_v12 }
 0x565   : > { %v3307_v55 = vcombine.low %v3299_v56, %v3306_v24  ;;  %v3079_v15 = vcombine.high %v3077_v60, %v3077_v60  ;;  %v3311_v21 = vcombine.low %v3078_v30, %v3077_v60  ;;  %v3399_v20 = vrot.slane %v3130_v53, %v4338_v35 }
 0x566   : > { %v3392_v62 = vrot.slane %v3385_v22, %v4338_v35  ;;  %v2965_v51 = vadd.f32 %v5476_v52, %v2946_v25  ;;  %v3162_v0 = vrot.slane %v3148_v17, %v4338_v35  ;;  %3382 = vrot.lane.b32.xlu0 %v3381_v36, %s4202_s27  ;;  %v3145_v59 = vrot.slane %v3131_v43, %v4338_v35 }
 0x567   : > { %3308 = vrot.lane.b32.xlu1 %v3307_v55, %s4202_s27  ;;  %v3318_v49 = vrot.slane %v3311_v21, %v4338_v35  ;;  %v3325_v5 = vrot.slane %v3079_v15, %v4338_v35  ;;  %v3155_v50 = vrot.slane %v2964_v27, %v4338_v35  ;;  %v3087_v37 = vrot.slane %v5520_v1, %v4338_v35 }
 0x568   : > { %v3400_v6 = vcombine.low %v3392_v62, %v3399_v20  ;;  %v3164_v2 = vcombine.high %v3162_v0, %v3162_v0  ;;  %v3172_v63 = vrot.slane %v2965_v51, %v4338_v35  ;;  %v3147_v52 = vcombine.high %v3145_v59, %v3145_v59 }
 0x569   : > { %v3326_v39 = vcombine.low %v3318_v49, %v3325_v5  ;;  %v3165_v46 = vcombine.high %v2965_v51, %v2965_v51  ;;  %v3163_v61 = vcombine.high %v3155_v50, %v3155_v50  ;;  %v3095_v38 = vcombine.high %v3087_v37, %v3087_v37 }
 0x56a   : > { %v3440_v29 = vcombine.low %v3162_v0, %v3164_v2  ;;  %v3454_v31 = vrot.slane %v3172_v63, %v4338_v35  ;;  %v3180_v8 = vcombine.high %v3172_v63, %v3172_v63  ;;  %3401 = vrot.lane.b32.xlu0 %v3400_v6, %s4203_s28  ;;  %v3421_v48 = vcombine.low %v3147_v52, %v3155_v50 }
 0x56b   : > { %3327 = vrot.lane.b32.xlu1 %v3326_v39, %s4203_s28  ;;  %v3179_v9 = vrot.slane %v3165_v46, %v4338_v35  ;;  %v3036_v10 = vrot.slane %v5495_v19, %v4338_v35  ;;  %v3330_v18 = vcombine.low %v3087_v37, %v3095_v38  ;;  %v3138_v54 = vrot.slane %v2963_v16, %v4338_v35 }
 0x56c   : > { %v3447_v41 = vrot.slane %v3440_v29, %v4338_v35  ;;  %v3428_v1 = vrot.slane %v3421_v48, %v4338_v35  ;;  %v3435_v57 = vrot.slane %v3163_v61, %v4338_v35  ;;  %v3344_v28 = vrot.slane %v5536_v4, %v4338_v35 }
 0x56d   : > { %v3181_v58 = vcombine.high %v3179_v9, %v3179_v9  ;;  %v3459_v40 = vcombine.low %v3180_v8, %v3179_v9  ;;  %v3044_v11 = vcombine.high %v3036_v10, %v3036_v10  ;;  %v3337_v12 = vrot.slane %v3330_v18, %v4338_v35 }
 0x56e   : > { %v3455_v45 = vcombine.low %v3447_v41, %v3454_v31  ;;  %v3146_v19 = vcombine.high %v3138_v54, %v3138_v54  ;;  %v3436_v23 = vcombine.low %v3428_v1, %v3435_v57  ;;  %v3270_v3 = vrot.slane %v5507_v14, %v4338_v35 }
 0x56f   : > { %v3256_v42 = vcombine.low %v3036_v10, %v3044_v11  ;;  %v3345_v24 = vcombine.low %v3337_v12, %v3344_v28  ;;  %v3466_v26 = vrot.slane %v3459_v40, %v4338_v35  ;;  %v3473_v13 = vrot.slane %v3181_v58, %v4338_v35 }
 0x570   : > { %3456 = vrot.lane.b32.xlu1 %v3455_v45, %s4202_s27  ;;  %v3404_v34 = vcombine.low %v3138_v54, %v3146_v19  ;;  %v3418_v7 = vrot.slane %v3145_v59, %v4338_v35 }
 0x571   : > { %v3263_v47 = vrot.slane %v3256_v42, %v4338_v35  ;;  %v3474_v30 = vcombine.low %v3466_v26, %v3473_v13 }
 0x572   : > { %v3411_v32 = vrot.slane %v3404_v34, %v4338_v35 }
 0x573   : > { %v3271_v4 = vcombine.low %v3263_v47, %v3270_v3 }
 0x574   : > { %3437 = vrot.lane.b32.xlu1 %v3436_v23, %s4204_s29  ;;  %v3419_v27 = vcombine.low %v3411_v32, %v3418_v7 }
 0x578   : > { %3475 = vrot.lane.b32.xlu1 %v3474_v30, %s4203_s28 }
 0x5c3   : > { %v3254_v16 = vpop.permute.xlu0 %3253 }
 0x5cb   : > { %v3216_v14 = vpop.permute.xlu1 %3215 }
 0x5cc   : > { %v3478_v33 = vsel %vm2428_vm8, %v5523_v44, %v3216_v14 }
 0x5cf   : > { %v3235_v56 = vpop.permute.xlu0 %3234 }
 0x5d0   : > { %v3479_v60 = vsel %vm2441_vm7, %v3478_v33, %v3235_v56 }
 0x5d1   : > { %v3480_v25 = vsel %vm2515_vm9, %v3479_v60, %v3254_v16 }
 0x5d2   : > { %3490 = vst [vmem:[%s293_s9] sm:$0x3f] %v3480_v25 }
 0x5d3   : > { %v3290_v35 = vpop.permute.xlu0 %3289 }
 0x5d4   : > { %v3364_v53 = vpop.permute.xlu1 %3363  ;;  %v3481_v36 = vsel %vm2428_vm8, %v3271_v4, %v3290_v35 }
 0x5d5   : > { %v3484_v43 = vsel %vm2428_vm8, %v3345_v24, %v3364_v53 }
 0x5d8   : > { %v3383_v17 = vpop.permute.xlu0 %3382 }
 0x5d9   : > { %v3309_v22 = vpop.permute.xlu1 %3308  ;;  %v3485_v15 = vsel %vm2441_vm7, %v3484_v43, %v3383_v17 }
 0x5da   : > { %v3482_v55 = vsel %vm2441_vm7, %v3481_v36, %v3309_v22 }
 0x5dc   : > { %v3402_v44 = vpop.permute.xlu0 %3401 }
 0x5dd   : > { %v3328_v21 = vpop.permute.xlu1 %3327  ;;  %v3486_v20 = vsel %vm2515_vm9, %v3485_v15, %v3402_v44 }
 0x5de   : > { %v3483_v62 = vsel %vm2515_vm9, %v3482_v55, %v3328_v21  ;;  %3492 = vst [vmem:[%s293_s9 + $0x10] sm:$0x3f] %v3486_v20 }
 0x5df   : > { %3491 = vst [vmem:[%s293_s9 + $0x8] sm:$0x3f] %v3483_v62 }
 0x5e2   : > { %v3457_v51 = vpop.permute.xlu1 %3456 }
 0x5e6   : > { %v3438_v0 = vpop.permute.xlu1 %3437 }
 0x5e7   : > { %v3487_v49 = vsel %vm2428_vm8, %v3419_v27, %v3438_v0 }
 0x5e8   : > { %v3488_v5 = vsel %vm2441_vm7, %v3487_v49, %v3457_v51 }
 0x5ea   : > { %v3476_v59 = vpop.permute.xlu1 %3475 }
 0x5eb   : > { %v3489_v6 = vsel %vm2515_vm9, %v3488_v5, %v3476_v59 }
 0x5ec   : > { %3493 = vst [vmem:[%s293_s9 + $0x18] sm:$0x3f] %v3489_v6 }
 0x5ed PF: > { %s18_s24 = sadd.s32 1, %s4196_s24  }
 0x5ee   : > { %p15_p3 = scmp.ge.s32.totalorder %s18_s24, 4  }
 0x5f0   :  { %17 = sbr.rel (!%p15_p3) target bundleno = 1 (0x1), region = 83 }
 0x5f7   :  { %3515 = vsyncpa [#allocation3], 1 }
 0x5f8   :  { %3517 = vsyncpa [#allocation3 + $0x1], 1 }

</bundles_post_ra>
